<compile_context>
chip_gen: v6e
topology: v6e:2x2x1
jax: 0.10.0
libtpu: 0.0.40
codegen_flags: <defaults>
</compile_context>

<pallas_src>
import functools
import math

import jax
import jax.numpy as jnp
from jax.experimental import pallas as pl
from jax.experimental.pallas import tpu as pltpu


def fusion_highway_kernel(enc_ref, kv_ref, w_ref, b_ref, out_ref, *, d):
    # concat([enc, kv], -1): in-register lane concat -> lane-dense LHS, one K=2H matmul.
    x = jnp.concatenate([enc_ref[...], kv_ref[...]], axis=-1)

    # One wide (N = 3*D) MXU matmul produces gate / nonlinear / linear together (f32 acc).
    acc = jnp.dot(x, w_ref[...], preferred_element_type=jnp.float32)
    acc = acc + b_ref[...]                          # bias kept/added in f32

    # D % 128 == 0 -> these lane slices are free aligned views (no XLU shuffles).
    gate = jax.nn.sigmoid(acc[:, 0:d])              # sigma(G(x))   (EUP, f32)
    nonlinear = jnp.maximum(acc[:, d:2 * d], 0.0)   # relu(N(x))    (VPU, f32)
    linear = acc[:, 2 * d:]                         # Q(x)

    # linear + gate*(nonlinear - linear) == gate*nonlinear + (1 - gate)*linear
    out_ref[...] = (linear + gate * (nonlinear - linear)).astype(out_ref.dtype)


def _vmem_capacity_bytes():
    # v7x has the smallest per-TC VMEM (64 MiB); use it as the safe fallback.
    try:
        return int(pltpu.get_tpu_info().vmem_capacity_bytes)
    except Exception:
        return 64 * 1024 * 1024


def fusion_module_forward(enc, kv, params, *, tm=1024,
                          compute_dtype=jnp.bfloat16, out_dtype=jnp.float32):
    """FusionModule forward (fusion_type='concat', 1 Highway layer, eval-mode dropout).

    enc, kv: [B, S, H] float32.  Returns [B, S, 2*H] in `out_dtype`.

    compute_dtype: dtype of the matmul operands (bf16 default -> native MXU rate on
                   v5e/v6e/v7x, half the activation/weight DMA bytes).  Accumulation
                   and the sigmoid/relu/blend epilogue always run in f32.
                   Pass jnp.float32 for exact-f32 results.
    out_dtype:     output dtype (bf16 halves writeback bytes if the consumer allows).
    """
    B, S, H = enc.shape
    D = 2 * H            # highway width; keep D % 128 == 0 (H % 64 == 0) for aligned slices
    N = 3 * D
    M = B * S

    wg, bg, wn, bn, wl, bl = params                 # weights pre-transposed [D_in, D_out]
    w_all = jnp.concatenate([wg, wn, wl], axis=1)   # [2H, 3D] fused weights
    b_all = jnp.concatenate([bg, bn, bl], axis=1)   # [1, 3D] fused biases (kept f32)

    if compute_dtype is None:
        compute_dtype = enc.dtype
    enc2 = enc.reshape(M, H).astype(compute_dtype)
    kv2 = kv.reshape(M, H).astype(compute_dtype)
    w_all = w_all.astype(compute_dtype)

    act_bytes = jnp.dtype(compute_dtype).itemsize
    w_bytes = act_bytes
    out_bytes = jnp.dtype(out_dtype).itemsize

    # Row tile: sublane-aligned (16 rows for packed sub-32-bit dtypes, else 8).
    row_align = 16 if act_bytes < 4 else 8
    tm = max(row_align, min(tm, M))
    tm = (tm // row_align) * row_align
    # Keep >=8 grid steps on large M so v7x's 2 TCs each get >=4 steps and the
    # double-buffered DMA pipeline keeps depth; don't shrink tiny demo inputs.
    if M >= 8 * 1024:
        tm = min(tm, max(row_align, ((M // 8) // row_align) * row_align))
    # Prefer a tm that divides M: avoids the extra HBM round trip of padding activations.
    if M % tm != 0:
        t = tm
        while t > row_align and M % t != 0:
            t -= row_align
        if M % t == 0:
            tm = t
    if M % tm == 0:
        m_pad = M
    else:  # last resort: ragged M with no aligned divisor
        m_pad = pl.cdiv(M, tm) * tm
        enc2 = jnp.pad(enc2, ((0, m_pad - M), (0, 0)))
        kv2 = jnp.pad(kv2, ((0, m_pad - M), (0, 0)))
    grid = (m_pad // tm,)

    cost = pl.CostEstimate(
        flops=2 * M * (2 * H) * N,
        transcendentals=M * D,                       # sigmoid exp
        bytes_accessed=(2 * M * H) * act_bytes + M * D * out_bytes
        + w_all.size * w_bytes + b_all.size * 4,
    )
    kernel = functools.partial(fusion_highway_kernel, d=D)
    vmem_cap = _vmem_capacity_bytes()

    def run(single_buffer_weights):
        w_pm = {"pipeline_mode": pl.Buffered(1)} if single_buffer_weights else {}
        w_bufs = 1 if single_buffer_weights else 2
        vmem_needed = (
            w_bufs * (w_all.size * w_bytes + b_all.size * 4)   # resident weights/bias
            + 2 * 2 * tm * H * act_bytes                       # enc + kv tiles, double-buffered
            + 2 * tm * D * out_bytes                           # output tile, double-buffered
            + tm * N * 4                                       # in-kernel f32 acc temporaries
        )
        headroom = 12 * 1024 * 1024                            # leave room for compiler scratch
        vmem_limit = int(min(max(vmem_needed + (4 << 20), 32 << 20),
                             max(vmem_cap - headroom, 16 << 20)))
        return pl.pallas_call(
            kernel,
            out_shape=jax.ShapeDtypeStruct((m_pad, D), out_dtype),
            grid=grid,
            in_specs=[
                pl.BlockSpec((tm, H), lambda i: (i, 0)),           # enc rows, pipelined
                pl.BlockSpec((tm, H), lambda i: (i, 0)),           # kv rows, pipelined
                pl.BlockSpec((D, N), lambda i: (0, 0), **w_pm),    # fused weights, VMEM-resident
                pl.BlockSpec((1, N), lambda i: (0, 0), **w_pm),    # fused biases, VMEM-resident
            ],
            out_specs=pl.BlockSpec((tm, D), lambda i: (i, 0)),
            compiler_params=pltpu.CompilerParams(
                dimension_semantics=("parallel",),
                vmem_limit_bytes=vmem_limit,
            ),
            cost_estimate=cost,
        )(enc2, kv2, w_all, b_all)

    try:
        out = jax.block_until_ready(run(True))   # single-buffered constant weight/bias blocks
    except Exception:
        out = run(False)                         # fallback: default double-buffered specs
    return out[:M].reshape(B, S, D)


def init_params(key, d):
    """Deterministic init mimicking nn.Linear(size, size): uniform(+-1/sqrt(fan_in)).
    Weights stored pre-transposed as [D_in, D_out]."""
    bound = 1.0 / math.sqrt(d)
    ks = jax.random.split(key, 6)
    wg = jax.random.uniform(ks[0], (d, d), jnp.float32, -bound, bound)
    bg = jax.random.uniform(ks[1], (1, d), jnp.float32, -bound, bound)
    wn = jax.random.uniform(ks[2], (d, d), jnp.float32, -bound, bound)
    bn = jax.random.uniform(ks[3], (1, d), jnp.float32, -bound, bound)
    wl = jax.random.uniform(ks[4], (d, d), jnp.float32, -bound, bound)
    bl = jax.random.uniform(ks[5], (1, d), jnp.float32, -bound, bound)
    return wg, bg, wn, bn, wl, bl


def reference_forward(enc, kv, params):
    """Plain-JAX reference reproducing the PyTorch forward (eval mode)."""
    wg, bg, wn, bn, wl, bl = params
    fused = jnp.concatenate([enc, kv], axis=-1)            # style_map['concat']
    x = fused                                              # dropout: identity in eval mode
    gate = jax.nn.sigmoid(x @ wg + bg[0])
    nonlinear = jax.nn.relu(x @ wn + bn[0])
    linear = x @ wl + bl[0]
    return gate * nonlinear + (1.0 - gate) * linear


if __name__ == "__main__":
    # Small but MXU/lane-friendly shapes: hidden H=64 -> fused/highway size D=128
    # (lane-dense output), M = B*S = 256 rows -> 2 grid steps at tm=128 (no padding).
    B, S, H = 2, 128, 64
    D = 2 * H

    key = jax.random.PRNGKey(0)
    k_enc, k_kv, k_par = jax.random.split(key, 3)
    enc = jax.random.normal(k_enc, (B, S, H), jnp.float32)
    kv = jax.random.normal(k_kv, (B, S, H), jnp.float32)
    params = init_params(k_par, D)

    ref = reference_forward(enc, kv, params)

    # Exact-f32 operand path: tight check against the pure-JAX reference.
    out_f32 = jax.block_until_ready(
        fusion_module_forward(enc, kv, params, tm=128, compute_dtype=jnp.float32))
    assert out_f32.shape == (B, S, D)
    assert jnp.allclose(out_f32, ref, atol=1e-4, rtol=1e-4), "f32 path mismatch vs reference"

    # Default bf16-operand path (f32 accumulation / f32 epilogue): looser tolerance.
    out_bf16 = jax.block_until_ready(fusion_module_forward(enc, kv, params, tm=128))
    assert out_bf16.shape == (B, S, D)
    assert jnp.allclose(out_bf16, ref, atol=5e-2, rtol=5e-2), "bf16 path mismatch vs reference"

    print("KERNEL_OK")
</pallas_src>

<mosaic_0001>
module attributes {stable_mosaic.version = 11 : i64} {
  func.func @fusion_highway_kernel(%arg0: i32, %arg1: memref<128x64xf32, #tpu.memory_space<vmem>>, %arg2: memref<128x64xf32, #tpu.memory_space<vmem>>, %arg3: memref<128x384xf32, #tpu.memory_space<vmem>>, %arg4: memref<1x384xf32, #tpu.memory_space<vmem>>, %arg5: memref<128x128xf32, #tpu.memory_space<vmem>>) attributes {dimension_semantics = [#tpu.dimension_semantics<parallel>], iteration_bounds = array<i64: 2>, scalar_prefetch = 0 : i64, scratch_operands = 0 : i64, tpu.core_type = #tpu.core_type<tc>, window_params = [{transform_indices = @transform_0, window_bounds = array<i64: 128, 64>}, {transform_indices = @transform_1, window_bounds = array<i64: 128, 64>}, {pipeline_mode = #tpu.pipeline_mode<synchronous>, transform_indices = @transform_2, window_bounds = array<i64: 128, 384>}, {pipeline_mode = #tpu.pipeline_mode<synchronous>, transform_indices = @transform_3, window_bounds = array<i64: 1, 384>}, {transform_indices = @transform_4, window_bounds = array<i64: 128, 128>}]} {
    %c0 = arith.constant 0 : index
    %c0_0 = arith.constant 0 : index
    %0 = vector.load %arg1[%c0, %c0_0] : memref<128x64xf32, #tpu.memory_space<vmem>>, vector<128x64xf32>
    %c0_1 = arith.constant 0 : index
    %c0_2 = arith.constant 0 : index
    %1 = vector.load %arg2[%c0_1, %c0_2] : memref<128x64xf32, #tpu.memory_space<vmem>>, vector<128x64xf32>
    %2 = tpu.concatenate %0, %1 in 1 : vector<128x64xf32>, vector<128x64xf32> -> vector<128x128xf32>
    %c0_3 = arith.constant 0 : index
    %c0_4 = arith.constant 0 : index
    %3 = vector.load %arg3[%c0_3, %c0_4] : memref<128x384xf32, #tpu.memory_space<vmem>>, vector<128x384xf32>
    %cst = arith.constant dense<0.000000e+00> : vector<128x384xf32>
    %4 = tpu.matmul %2, %3, %cst {dimension_numbers = #tpu.dot_dimension_numbers<[1], [0], [0], [1], [0, 0, 1, 1], [], []>} : vector<128x128xf32>, vector<128x384xf32>, vector<128x384xf32> -> vector<128x384xf32>
    %c0_5 = arith.constant 0 : index
    %c0_6 = arith.constant 0 : index
    %5 = vector.load %arg4[%c0_5, %c0_6] : memref<1x384xf32, #tpu.memory_space<vmem>>, vector<1x384xf32>
    %6 = vector.broadcast %5 : vector<1x384xf32> to vector<128x384xf32>
    %7 = arith.addf %4, %6 : vector<128x384xf32>
    %8 = vector.extract_strided_slice %7 {offsets = [0, 0], sizes = [128, 128], strides = [1, 1]} : vector<128x384xf32> to vector<128x128xf32>
    %9 = arith.negf %8 : vector<128x128xf32>
    %10 = math.exp %9 : vector<128x128xf32>
    %cst_7 = arith.constant 1.000000e+00 : f32
    %11 = vector.broadcast %cst_7 : f32 to vector<128x128xf32>
    %12 = arith.addf %11, %10 : vector<128x128xf32>
    %13 = arith.divf %11, %12 : vector<128x128xf32>
    %14 = vector.extract_strided_slice %7 {offsets = [0, 128], sizes = [128, 128], strides = [1, 1]} : vector<128x384xf32> to vector<128x128xf32>
    %cst_8 = arith.constant 0.000000e+00 : f32
    %15 = vector.broadcast %cst_8 : f32 to vector<128x128xf32>
    %16 = arith.maximumf %14, %15 : vector<128x128xf32>
    %17 = vector.extract_strided_slice %7 {offsets = [0, 256], sizes = [128, 128], strides = [1, 1]} : vector<128x384xf32> to vector<128x128xf32>
    %18 = arith.subf %16, %17 : vector<128x128xf32>
    %19 = arith.mulf %13, %18 : vector<128x128xf32>
    %20 = arith.addf %17, %19 : vector<128x128xf32>
    %c0_9 = arith.constant 0 : index
    %c0_10 = arith.constant 0 : index
    %21 = vector.load %arg5[%c0_9, %c0_10] : memref<128x128xf32, #tpu.memory_space<vmem>>, vector<128x128xf32>
    tpu.vector_store %arg5[%c0_9, %c0_10], %20 {strides = array<i32>} : memref<128x128xf32, #tpu.memory_space<vmem>>, vector<128x128xf32>,
    return
  }
  func.func @transform_0(%arg0: i32) -> (i32, i32) {
    %c0_i32 = arith.constant 0 : i32
    %c0_i32_0 = arith.constant 0 : i32
    return %arg0, %c0_i32 : i32, i32
  }
  func.func @transform_1(%arg0: i32) -> (i32, i32) {
    %c0_i32 = arith.constant 0 : i32
    %c0_i32_0 = arith.constant 0 : i32
    return %arg0, %c0_i32 : i32, i32
  }
  func.func @transform_2(%arg0: i32) -> (i32, i32) {
    %c0_i32 = arith.constant 0 : i32
    %c0_i32_0 = arith.constant 0 : i32
    %c0_i32_1 = arith.constant 0 : i32
    return %c0_i32, %c0_i32_0 : i32, i32
  }
  func.func @transform_3(%arg0: i32) -> (i32, i32) {
    %c0_i32 = arith.constant 0 : i32
    %c0_i32_0 = arith.constant 0 : i32
    %c0_i32_1 = arith.constant 0 : i32
    return %c0_i32, %c0_i32_0 : i32, i32
  }
  func.func @transform_4(%arg0: i32) -> (i32, i32) {
    %c0_i32 = arith.constant 0 : i32
    %c0_i32_0 = arith.constant 0 : i32
    return %arg0, %c0_i32 : i32, i32
  }
}

module attributes {stable_mosaic.version = 11 : i64} {
  func.func @fusion_highway_kernel(%arg0: i32, %arg1: memref<128x64xf32, #tpu.memory_space<vmem>>, %arg2: memref<128x64xf32, #tpu.memory_space<vmem>>, %arg3: memref<128x384xf32, #tpu.memory_space<vmem>>, %arg4: memref<1x384xf32, #tpu.memory_space<vmem>>, %arg5: memref<128x128xf32, #tpu.memory_space<vmem>>) attributes {dimension_semantics = [#tpu.dimension_semantics<parallel>], iteration_bounds = array<i64: 2>, scalar_prefetch = 0 : i64, scratch_operands = 0 : i64, tpu.core_type = #tpu.core_type<tc>, window_params = [{transform_indices = @transform_0, window_bounds = array<i64: 128, 64>}, {transform_indices = @transform_1, window_bounds = array<i64: 128, 64>}, {pipeline_mode = #tpu.pipeline_mode<synchronous>, transform_indices = @transform_2, window_bounds = array<i64: 128, 384>}, {pipeline_mode = #tpu.pipeline_mode<synchronous>, transform_indices = @transform_3, window_bounds = array<i64: 1, 384>}, {transform_indices = @transform_4, window_bounds = array<i64: 128, 128>}]} {
    %c0 = arith.constant 0 : index
    %c0_0 = arith.constant 0 : index
    %0 = vector.load %arg1[%c0, %c0_0] : memref<128x64xf32, #tpu.memory_space<vmem>>, vector<128x64xf32>
    %c0_1 = arith.constant 0 : index
    %c0_2 = arith.constant 0 : index
    %1 = vector.load %arg2[%c0_1, %c0_2] : memref<128x64xf32, #tpu.memory_space<vmem>>, vector<128x64xf32>
    %2 = tpu.concatenate %0, %1 in 1 : vector<128x64xf32>, vector<128x64xf32> -> vector<128x128xf32>
    %c0_3 = arith.constant 0 : index
    %c0_4 = arith.constant 0 : index
    %3 = vector.load %arg3[%c0_3, %c0_4] : memref<128x384xf32, #tpu.memory_space<vmem>>, vector<128x384xf32>
    %cst = arith.constant dense<0.000000e+00> : vector<128x384xf32>
    %4 = tpu.matmul %2, %3, %cst {dimension_numbers = #tpu.dot_dimension_numbers<[1], [0], [0], [1], [0, 0, 1, 1], [], []>} : vector<128x128xf32>, vector<128x384xf32>, vector<128x384xf32> -> vector<128x384xf32>
    %c0_5 = arith.constant 0 : index
    %c0_6 = arith.constant 0 : index
    %5 = vector.load %arg4[%c0_5, %c0_6] : memref<1x384xf32, #tpu.memory_space<vmem>>, vector<1x384xf32>
    %6 = vector.broadcast %5 : vector<1x384xf32> to vector<128x384xf32>
    %7 = arith.addf %4, %6 : vector<128x384xf32>
    %8 = vector.extract_strided_slice %7 {offsets = [0, 0], sizes = [128, 128], strides = [1, 1]} : vector<128x384xf32> to vector<128x128xf32>
    %9 = arith.negf %8 : vector<128x128xf32>
    %10 = math.exp %9 : vector<128x128xf32>
    %cst_7 = arith.constant 1.000000e+00 : f32
    %11 = vector.broadcast %cst_7 : f32 to vector<128x128xf32>
    %12 = arith.addf %11, %10 : vector<128x128xf32>
    %13 = arith.divf %11, %12 : vector<128x128xf32>
    %14 = vector.extract_strided_slice %7 {offsets = [0, 128], sizes = [128, 128], strides = [1, 1]} : vector<128x384xf32> to vector<128x128xf32>
    %cst_8 = arith.constant 0.000000e+00 : f32
    %15 = vector.broadcast %cst_8 : f32 to vector<128x128xf32>
    %16 = arith.maximumf %14, %15 : vector<128x128xf32>
    %17 = vector.extract_strided_slice %7 {offsets = [0, 256], sizes = [128, 128], strides = [1, 1]} : vector<128x384xf32> to vector<128x128xf32>
    %18 = arith.subf %16, %17 : vector<128x128xf32>
    %19 = arith.mulf %13, %18 : vector<128x128xf32>
    %20 = arith.addf %17, %19 : vector<128x128xf32>
    %c0_9 = arith.constant 0 : index
    %c0_10 = arith.constant 0 : index
    %21 = vector.load %arg5[%c0_9, %c0_10] : memref<128x128xf32, #tpu.memory_space<vmem>>, vector<128x128xf32>
    tpu.vector_store %arg5[%c0_9, %c0_10], %20 {strides = array<i32>} : memref<128x128xf32, #tpu.memory_space<vmem>>, vector<128x128xf32>,
    return
  }
  func.func @transform_0(%arg0: i32) -> (i32, i32) {
    %c0_i32 = arith.constant 0 : i32
    %c0_i32_0 = arith.constant 0 : i32
    return %arg0, %c0_i32 : i32, i32
  }
  func.func @transform_1(%arg0: i32) -> (i32, i32) {
    %c0_i32 = arith.constant 0 : i32
    %c0_i32_0 = arith.constant 0 : i32
    return %arg0, %c0_i32 : i32, i32
  }
  func.func @transform_2(%arg0: i32) -> (i32, i32) {
    %c0_i32 = arith.constant 0 : i32
    %c0_i32_0 = arith.constant 0 : i32
    %c0_i32_1 = arith.constant 0 : i32
    return %c0_i32, %c0_i32_0 : i32, i32
  }
  func.func @transform_3(%arg0: i32) -> (i32, i32) {
    %c0_i32 = arith.constant 0 : i32
    %c0_i32_0 = arith.constant 0 : i32
    %c0_i32_1 = arith.constant 0 : i32
    return %c0_i32, %c0_i32_0 : i32, i32
  }
  func.func @transform_4(%arg0: i32) -> (i32, i32) {
    %c0_i32 = arith.constant 0 : i32
    %c0_i32_0 = arith.constant 0 : i32
    return %arg0, %c0_i32 : i32, i32
  }
}

</mosaic_0001>

<bundles_post_ra>
// kernel: tpu_custom_call.1
= control target key start
LH: loop header
LB: loop body
LE: loop exit
PB: predicated region body
PF: predicated region fallthrough
CT: control target
= control target key end

     0   :  { %9 = vsyncpa [#allocation3], 0  ;;  %s1739_s0 = inlined_call_operand.vmem [shape: f32[256,64], index: 0, kind: input, shape index: {}]   ;;  %s1740_s1 = inlined_call_operand.vmem [shape: f32[256,64], index: 1, kind: input, shape index: {}]   ;;  %s1741_s2 = inlined_call_operand.vmem [shape: f32[128,384], index: 2, kind: input, shape index: {}]   ;;  %s1742_s3 = inlined_call_operand.vmem [shape: f32[1,384], index: 3, kind: input, shape index: {}]   ;;  %s1743_s4 = inlined_call_operand.hbm [shape: f32[256,128], index: 4, kind: output, shape index: {}]  }
   0x1   :  { %11 = vsyncpa [#allocation3 + $0x1], 0  ;;  %s1287_s15 = smov 0   ;;  %s1289_s16 = smov 0  }
   0x2   :  { %s1291_s17 = smov 0   ;;  %s1293_s18 = smov 0  }
   0x3 LB: > { %s1308_s19 = sadd.s32 4294967295, %s1255_s18   ;;  %s969_s20 = sadd.s32 4294967294, %s1255_s18   ;;  %s1255_s18 = sphi %s1293_s18, %s1749_s18   ;;  %s1251_s17 = sphi %s1291_s17, %s1748_s17   ;;  %s1247_s16 = sphi %s1289_s16, %s1747_s16   ;;  %s1243_s15 = sphi %s1287_s15, %s1746_s15  }
   0x4   : > { %s1312_s21 = sadd.s32 1, %s1255_s18   ;;  %s118_s22 = sadd.s32 1, %s1251_s17 }
   0x5   : > { %s115_s23 = ssub.s32 %s1255_s18, %s1312_s21  ;;  %p128_p0 = scmp.ne.s32.totalorder %s1251_s17, %s1247_s16 }
   0x6   : > { %p116_p1 = scmp.eq.s32.totalorder %s115_s23, 0  ;;  %p129_p2 = scmp.eq.s32.totalorder %s1308_s19, 1 }
   0x7   : > { %p134_p3 = scmp.ne.s32.totalorder %s1247_s16, %s1243_s15  ;;  %p135_p4 = scmp.eq.s32.totalorder %s969_s20, 1 }
   0x8   : > { %s1323_s24 = scalar_select %p116_p1, %s1251_s17, %s118_s22  }
   0x9   : > { %p1325_p5 = por %p129_p2, %p128_p0  ;;  %p1329_p6 = por %p135_p4, %p134_p3 }
   0xa   : > { %p972_p7 = scmp.ge.s32.totalorder %s1255_s18, 1  ;;  %p177_p8 = scmp.lt.s32.totalorder %s1255_s18, 3 }
   0xc   : > { %p178_p9 = pnand %p972_p7, %p177_p8 }
   0xd   : > { %s974_s27 = sshll.u32 (!%p178_p9), %s1308_s19, 4  ;;  %s1258_s22 = smov (!%p178_p9), 64  }
   0xe   : > { %181 = sbr.rel (%p178_p9) target bundleno = 449 (0x1c1), region = 36  ;;  %p209_p10 = scmp.lt.s32.totalorder (!%p178_p9), %s974_s27, 31 }
   0xf   : > { %s205_s8 = sand.u32 (!%p178_p9), 1, %s1247_s16   ;;  %s999_s12 = sshll.u32 (!%p178_p9), %s1308_s19, 11 }
  0x10   : > { %s973_s10 = sshll.u32 (!%p178_p9), %s205_s8, 7  ;;  %s1692_s20 = scalar_lea.hbm (!%p178_p9), %s1743_s4, %s999_s12 }
  0x11   : > { %s1618_s11 = scalar_lea.vmem (!%p178_p9), [#allocation2], %s973_s10  ;;  %s1699_s23 = scalar_lea.sflag (!%p178_p9), [#allocation3], %s205_s8 }
  0x12   : > { %s895_s13 = sshll.u32 (!%p178_p9), %s1618_s11, 4  ;;  %s1259_s28 = smov (!%p178_p9), [#allocation2]   ;;  %s1694_s13 = int_to_ptr.vmem [resolvable:$true] %s895_s13 }
  0x13   : > { %v380_v0 = vld [vmem:[%s1741_s2 + $0x170] sm:$0xff]  ;;  %v379_v1 = vld [vmem:[%s1741_s2 + $0x168] sm:$0xff]  ;;  %v377_v2 = vld [vmem:[%s1741_s2 + $0x158] sm:$0xff]  ;;  %v1257_v5 = vmov 0.0   ;;  %s1751_s27 = smov (!%p209_p10, %s974_s27), 31  ;;  %vm317_vm0 = vcmask 523264  }
  0x14   : > { %399 = vmatprep.subr.mxu0 %v380_v0  ;;  %v376_v3 = vld [vmem:[%s1741_s2 + $0x150] sm:$0xff]  ;;  %v381_v4 = vld [vmem:[%s1741_s2 + $0x178] sm:$0xff]  ;;  %463 = vmatprep.mubr.f32.mxu0 %v1257_v5  ;;  %v374_v6 = vld [vmem:[%s1741_s2 + $0x140] sm:$0xff]  ;;  %s975_s6 = sshll.u32 %s1751_s27, 3  ;;  %s1195_s19 = scalar_lea.vmem %s1694_s13, 2048 }
  0x15   : > { %400 = vmatpush1.msra.mxu0 %v379_v1  ;;  %1032 = vmatprep.subr.mxu1 %v381_v4  ;;  %v378_v7 = vld [vmem:[%s1741_s2 + $0x160] sm:$0xff]  ;;  %v373_v8 = vld [vmem:[%s1741_s2 + $0x138] sm:$0xff]  ;;  %v375_v9 = vld [vmem:[%s1741_s2 + $0x148] sm:$0xff]  ;;  %s1375_s9 = scalar_lea.vmem %s1740_s1, %s975_s6  ;;  %s1528_s7 = scalar_lea.vmem %s1739_s0, %s975_s6 }
  0x16   : > { %401 = vmatprep.subr.mxu0 %v377_v2  ;;  %1033 = vmatpush3.msra.mxu1 %v381_v4  ;;  %v371_v10 = vld [vmem:[%s1741_s2 + $0x128] sm:$0xff]  ;;  %v370_v11 = vld [vmem:[%s1741_s2 + $0x120] sm:$0xff]  ;;  %v372_v12 = vld [vmem:[%s1741_s2 + $0x130] sm:$0xff]  ;;  %p1196_p11 = scmp.ne.s32.totalorder %s1694_s13, %s1195_s19  ;;  %s1199_s29 = sshll.u32 %s1259_s28, 4  ;;  %s1200_s29 = int_to_ptr.vmem [resolvable:$false] %s1199_s29 }
  0x17   : > { %402 = vmatpush1.msra.mxu0 %v376_v3  ;;  %1034 = vmatprep.subr.mxu1 %v378_v7  ;;  %v237_v13 = vld [vmem:[%s1375_s9] sm:$0xff]  ;;  %v239_v14 = vld [vmem:[%s1375_s9 + $0x10] sm:$0xff]  ;;  %v367_v16 = vld [vmem:[%s1741_s2 + $0x108] sm:$0xff]  ;;  %s1201_s30 = scalar_lea.vmem %s1200_s29, 4096  ;;  %p1202_p0 = scmp.lt.s32.totalorder %s1694_s13, %s1200_s29 }
  0x18   : > { %403 = vmatprep.subr.mxu0 %v374_v6  ;;  %1035 = vmatpush3.msra.mxu1 %v378_v7  ;;  %v368_v15 = vld [vmem:[%s1741_s2 + $0x110] sm:$0xff]  ;;  %v369_v17 = vld [vmem:[%s1741_s2 + $0x118] sm:$0xff]  ;;  %v238_v18 = vld [vmem:[%s1375_s9 + $0x8] sm:$0xff]  ;;  %p1197_p12 = pnand %p1196_p11, %p1325_p5  ;;  %p1203_p1 = scmp.lt.s32.totalorder %s1201_s30, %s1195_s19 }
  0x19   : > { %404 = vmatpush1.msra.mxu0 %v373_v8  ;;  %1036 = vmatprep.subr.mxu1 %v375_v9  ;;  %v240_v19 = vld [vmem:[%s1375_s9 + $0x18] sm:$0xff]  ;;  %v364_v21 = vld [vmem:[%s1741_s2 + $0xf0] sm:$0xff]  ;;  %v366_v22 = vld [vmem:[%s1741_s2 + $0x100] sm:$0xff] }
  0x1a   : > { %405 = vmatprep.subr.mxu0 %v371_v10  ;;  %1037 = vmatpush3.msra.mxu1 %v375_v9  ;;  %v365_v20 = vld [vmem:[%s1741_s2 + $0xf8] sm:$0xff]  ;;  %v362_v23 = vld [vmem:[%s1741_s2 + $0xe0] sm:$0xff]  ;;  %v242_v25 = vld [vmem:[%s1375_s9 + $0x28] sm:$0xff]  ;;  %p1198_p13 = pneg %p1197_p12  ;;  %p1204_p2 = por %p1203_p1, %p1202_p0 }
  0x1b   : > { %269 = vrot.lane.b32.xlu0 %v237_v13, %s1258_s22  ;;  %273 = vrot.lane.b32.xlu1 %v239_v14, %s1258_s22  ;;  %v241_v24 = vld [vmem:[%s1375_s9 + $0x20] sm:$0xff]  ;;  %v361_v26 = vld [vmem:[%s1741_s2 + $0xd8] sm:$0xff] }
  0x1c   : > { %406 = vmatpush1.msra.mxu0 %v370_v11  ;;  %1038 = vmatprep.subr.mxu1 %v372_v12  ;;  %v363_v27 = vld [vmem:[%s1741_s2 + $0xe8] sm:$0xff]  ;;  %v358_v29 = vld [vmem:[%s1741_s2 + $0xc0] sm:$0xff]  ;;  %v360_v30 = vld [vmem:[%s1741_s2 + $0xd0] sm:$0xff]  ;;  %p1205_p3 = pnand %p1204_p2, %p1198_p13 }
  0x1d   : > { %407 = vmatprep.subr.mxu0 %v368_v15  ;;  %1039 = vmatpush3.msra.mxu1 %v372_v12  ;;  %v359_v28 = vld [vmem:[%s1741_s2 + $0xc8] sm:$0xff]  ;;  %v243_v31 = vld [vmem:[%s1375_s9 + $0x30] sm:$0xff]  ;;  %v244_v32 = vld [vmem:[%s1375_s9 + $0x38] sm:$0xff] }
  0x1e   : > { %408 = vmatpush1.msra.mxu0 %v367_v16  ;;  %1040 = vmatprep.subr.mxu1 %v369_v17  ;;  %v356_v33 = vld [vmem:[%s1741_s2 + $0xb0] sm:$0xff]  ;;  %v355_v34 = vld [vmem:[%s1741_s2 + $0xa8] sm:$0xff]  ;;  %v357_v35 = vld [vmem:[%s1741_s2 + $0xb8] sm:$0xff] }
  0x1f   : > { %271 = vrot.lane.b32.xlu0 %v238_v18, %s1258_s22  ;;  %275 = vrot.lane.b32.xlu1 %v240_v19, %s1258_s22  ;;  %v353_v36 = vld [vmem:[%s1741_s2 + $0x98] sm:$0xff]  ;;  %v245_v37 = vld [vmem:[%s1375_s9 + $0x40] sm:$0xff] }
  0x20   : > { %409 = vmatprep.subr.mxu0 %v365_v20  ;;  %1041 = vmatpush3.msra.mxu1 %v369_v17  ;;  %v246_v38 = vld [vmem:[%s1375_s9 + $0x48] sm:$0xff]  ;;  %v352_v39 = vld [vmem:[%s1741_s2 + $0x90] sm:$0xff]  ;;  %v354_v40 = vld [vmem:[%s1741_s2 + $0xa0] sm:$0xff] }
  0x21   : > { %410 = vmatpush1.msra.mxu0 %v364_v21  ;;  %1042 = vmatprep.subr.mxu1 %v366_v22  ;;  %v350_v41 = vld [vmem:[%s1741_s2 + $0x80] sm:$0xff]  ;;  %v349_v42 = vld [vmem:[%s1741_s2 + $0x78] sm:$0xff]  ;;  %v351_v43 = vld [vmem:[%s1741_s2 + $0x88] sm:$0xff] }
  0x22   : > { %411 = vmatprep.subr.mxu0 %v362_v23  ;;  %1043 = vmatpush3.msra.mxu1 %v366_v22  ;;  %v247_v44 = vld [vmem:[%s1375_s9 + $0x50] sm:$0xff]  ;;  %v248_v45 = vld [vmem:[%s1375_s9 + $0x58] sm:$0xff]  ;;  %v347_v46 = vld [vmem:[%s1741_s2 + $0x68] sm:$0xff] }
  0x23   : > { %277 = vrot.lane.b32.xlu0 %v241_v24, %s1258_s22  ;;  %279 = vrot.lane.b32.xlu1 %v242_v25, %s1258_s22  ;;  %v346_v47 = vld [vmem:[%s1741_s2 + $0x60] sm:$0xff]  ;;  %v348_v48 = vld [vmem:[%s1741_s2 + $0x70] sm:$0xff] }
  0x24   : > { %412 = vmatpush1.msra.mxu0 %v361_v26  ;;  %1044 = vmatprep.subr.mxu1 %v363_v27  ;;  %v344_v49 = vld [vmem:[%s1741_s2 + $0x50] sm:$0xff]  ;;  %v249_v50 = vld [vmem:[%s1375_s9 + $0x60] sm:$0xff]  ;;  %v250_v51 = vld [vmem:[%s1375_s9 + $0x68] sm:$0xff] }
  0x25   : > { %413 = vmatprep.subr.mxu0 %v359_v28  ;;  %1045 = vmatpush3.msra.mxu1 %v363_v27  ;;  %v343_v52 = vld [vmem:[%s1741_s2 + $0x48] sm:$0xff]  ;;  %v345_v53 = vld [vmem:[%s1741_s2 + $0x58] sm:$0xff]  ;;  %v340_v55 = vld [vmem:[%s1741_s2 + $0x30] sm:$0xff] }
  0x26   : > { %414 = vmatpush1.msra.mxu0 %v358_v29  ;;  %1046 = vmatprep.subr.mxu1 %v360_v30  ;;  %v341_v54 = vld [vmem:[%s1741_s2 + $0x38] sm:$0xff]  ;;  %v342_v56 = vld [vmem:[%s1741_s2 + $0x40] sm:$0xff]  ;;  %v251_v57 = vld [vmem:[%s1375_s9 + $0x70] sm:$0xff] }
  0x27   : > { %281 = vrot.lane.b32.xlu0 %v243_v31, %s1258_s22  ;;  %283 = vrot.lane.b32.xlu1 %v244_v32, %s1258_s22  ;;  %v252_v58 = vld [vmem:[%s1375_s9 + $0x78] sm:$0xff]  ;;  %v338_v59 = vld [vmem:[%s1741_s2 + $0x20] sm:$0xff] }
  0x28   : > { %415 = vmatprep.subr.mxu0 %v356_v33  ;;  %1047 = vmatpush3.msra.mxu1 %v360_v30  ;;  %v337_v60 = vld [vmem:[%s1741_s2 + $0x18] sm:$0xff]  ;;  %v339_v61 = vld [vmem:[%s1741_s2 + $0x28] sm:$0xff]  ;;  %v334_v63 = vld [vmem:[%s1741_s2] sm:$0xff] }
  0x29   : > { %416 = vmatpush1.msra.mxu0 %v355_v34  ;;  %1048 = vmatprep.subr.mxu1 %v357_v35  ;;  %v335_v62 = vld [vmem:[%s1741_s2 + $0x8] sm:$0xff]  ;;  %v336_v0 = vld [vmem:[%s1741_s2 + $0x10] sm:$0xff]  ;;  %v221_v1 = vld [vmem:[%s1528_s7] sm:$0xff] }
  0x2a   : > { %417 = vmatprep.subr.mxu0 %v353_v36  ;;  %1049 = vmatpush3.msra.mxu1 %v357_v35  ;;  %v223_v6 = vld [vmem:[%s1528_s7 + $0x10] sm:$0xff]  ;;  %v222_v7 = vld [vmem:[%s1528_s7 + $0x8] sm:$0xff]  ;;  %v224_v11 = vld [vmem:[%s1528_s7 + $0x18] sm:$0xff] }
  0x2b   : > { %285 = vrot.lane.b32.xlu0 %v245_v37, %s1258_s22  ;;  %287 = vrot.lane.b32.xlu1 %v246_v38, %s1258_s22  ;;  %v225_v13 = vld [vmem:[%s1528_s7 + $0x20] sm:$0xff]  ;;  %v226_v17 = vld [vmem:[%s1528_s7 + $0x28] sm:$0xff] }
  0x2c   : > { %418 = vmatpush1.msra.mxu0 %v352_v39  ;;  %1050 = vmatprep.subr.mxu1 %v354_v40  ;;  %v227_v19 = vld [vmem:[%s1528_s7 + $0x30] sm:$0xff]  ;;  %v228_v23 = vld [vmem:[%s1528_s7 + $0x38] sm:$0xff]  ;;  %v229_v25 = vld [vmem:[%s1528_s7 + $0x40] sm:$0xff] }
  0x2d   : > { %419 = vmatprep.subr.mxu0 %v350_v41  ;;  %1051 = vmatpush3.msra.mxu1 %v354_v40  ;;  %v230_v29 = vld [vmem:[%s1528_s7 + $0x48] sm:$0xff]  ;;  %v231_v31 = vld [vmem:[%s1528_s7 + $0x50] sm:$0xff]  ;;  %v232_v35 = vld [vmem:[%s1528_s7 + $0x58] sm:$0xff] }
  0x2e   : > { %420 = vmatpush1.msra.mxu0 %v349_v42  ;;  %1052 = vmatprep.subr.mxu1 %v351_v43  ;;  %v233_v37 = vld [vmem:[%s1528_s7 + $0x60] sm:$0xff]  ;;  %v234_v41 = vld [vmem:[%s1528_s7 + $0x68] sm:$0xff] }
  0x2f   : > { %289 = vrot.lane.b32.xlu0 %v247_v44, %s1258_s22  ;;  %291 = vrot.lane.b32.xlu1 %v248_v45, %s1258_s22 }
  0x30   : > { %421 = vmatprep.subr.mxu0 %v347_v46  ;;  %1053 = vmatpush3.msra.mxu1 %v351_v43  ;;  %v235_v43 = vld [vmem:[%s1528_s7 + $0x70] sm:$0xff] }
  0x31   : > { %422 = vmatpush1.msra.mxu0 %v346_v47  ;;  %1054 = vmatprep.subr.mxu1 %v348_v48  ;;  %v236_v47 = vld [vmem:[%s1528_s7 + $0x78] sm:$0xff] }
  0x32   : > { %423 = vmatprep.subr.mxu0 %v344_v49  ;;  %1055 = vmatpush3.msra.mxu1 %v348_v48 }
  0x33   : > { %293 = vrot.lane.b32.xlu0 %v249_v50, %s1258_s22  ;;  %295 = vrot.lane.b32.xlu1 %v250_v51, %s1258_s22  ;;  %v384_v50 = vlaneseq }
  0x34   : > { %424 = vmatpush1.msra.mxu0 %v343_v52  ;;  %1056 = vmatprep.subr.mxu1 %v345_v53 }
  0x35   : > { %425 = vmatprep.subr.mxu0 %v341_v54  ;;  %1057 = vmatpush3.msra.mxu1 %v345_v53  ;;  %v385_v51 = vshrl.u32 %v384_v50, 7  ;;  %v382_v53 = vld [vmem:[%s1742_s3] sm:$0x7] }
  0x36   : > { %426 = vmatpush1.msra.mxu0 %v340_v55  ;;  %1058 = vmatprep.subr.mxu1 %v342_v56 }
  0x37   : > { %297 = vrot.lane.b32.xlu0 %v251_v57, %s1258_s22  ;;  %299 = vrot.lane.b32.xlu1 %v252_v58, %s1258_s22  ;;  %v386_v52 = vsub.s32 0, %v385_v51 }
  0x38   : > { %427 = vmatprep.subr.mxu0 %v338_v59  ;;  %1059 = vmatpush3.msra.mxu1 %v342_v56 }
  0x39   : > { %428 = vmatpush1.msra.mxu0 %v337_v60  ;;  %1060 = vmatprep.subr.mxu1 %v339_v61  ;;  %v1580_v54 = vrot.slane %v382_v53, %v386_v52 }
  0x3a   : > { %429 = vmatprep.subr.mxu0 %v335_v62  ;;  %1061 = vmatpush3.msra.mxu1 %v339_v61 }
  0x3b   : > { %430 = vmatpush1.msra.mxu0 %v334_v63  ;;  %1062 = vmatprep.subr.mxu1 %v336_v0 }
  0x3c   : > { %1063 = vmatpush3.msra.mxu1 %v336_v0 }
  0x8d   : > { %v270_v2 = vpop.permute.xlu0 %269  ;;  %v274_v3 = vpop.permute.xlu1 %273 }
  0x8e   : > { %v318_v4 = vsel %vm317_vm0, %v221_v1, %v270_v2  ;;  %v320_v10 = vsel %vm317_vm0, %v223_v6, %v274_v3 }
  0x8f   : > { %464 = vmatmul.mubr.f32.vlgmr.msra.gmra.mxu0 %v318_v4  ;;  %1064 = vmatprep.mubr.f32.mxu1 %v318_v4 }
  0x90   : > { %469 = vmatprep.mubr.f32.mxu0 %v1257_v5 }
  0x91   : > { %v272_v8 = vpop.permute.xlu0 %271  ;;  %v276_v9 = vpop.permute.xlu1 %275 }
  0x92   : > { %v319_v12 = vsel %vm317_vm0, %v222_v7, %v272_v8  ;;  %v321_v14 = vsel %vm317_vm0, %v224_v11, %v276_v9 }
  0x93   : > { %470 = vmatmul.mubr.f32.gmra.mxu0 %v319_v12  ;;  %1065 = vmatmul.mubr.f32.vlgmr.msra.gmra.mxu1 %v319_v12  ;;  %v390_v12 = vsub.s32 1, %v385_v51 }
  0x94   : > { %475 = vmatprep.mubr.f32.mxu0 %v1257_v5  ;;  %1067 = vmatprep.mubr.f32.mxu1 %v320_v10 }
  0x95   : > { %v278_v15 = vpop.permute.xlu0 %277  ;;  %v280_v16 = vpop.permute.xlu1 %279 }
  0x96   : > { %v322_v18 = vsel %vm317_vm0, %v225_v13, %v278_v15  ;;  %v323_v20 = vsel %vm317_vm0, %v226_v17, %v280_v16 }
  0x97   : > { %476 = vmatmul.mubr.f32.gmra.mxu0 %v320_v10  ;;  %1068 = vmatmul.mubr.f32.gmra.mxu1 %v321_v14 }
  0x98   : > { %481 = vmatprep.mubr.f32.mxu0 %v1257_v5  ;;  %1070 = vmatprep.mubr.f32.mxu1 %v322_v18 }
  0x99   : > { %v282_v21 = vpop.permute.xlu0 %281  ;;  %v284_v22 = vpop.permute.xlu1 %283 }
  0x9a   : > { %v324_v24 = vsel %vm317_vm0, %v227_v19, %v282_v21  ;;  %v325_v26 = vsel %vm317_vm0, %v228_v23, %v284_v22  ;;  %v1592_v19 = vrot.slane %v382_v53, %v390_v12  ;;  %v394_v21 = vsub.s32 2, %v385_v51 }
  0x9b   : > { %482 = vmatmul.mubr.f32.gmra.mxu0 %v321_v14  ;;  %1071 = vmatmul.mubr.f32.gmra.mxu1 %v323_v20 }
  0x9c   : > { %487 = vmatprep.mubr.f32.mxu0 %v1257_v5  ;;  %1073 = vmatprep.mubr.f32.mxu1 %v324_v24 }
  0x9d   : > { %v286_v27 = vpop.permute.xlu0 %285  ;;  %v288_v28 = vpop.permute.xlu1 %287 }
  0x9e   : > { %v326_v30 = vsel %vm317_vm0, %v229_v25, %v286_v27  ;;  %v327_v32 = vsel %vm317_vm0, %v230_v29, %v288_v28  ;;  %v1598_v29 = vrot.slane %v382_v53, %v394_v21 }
  0x9f   : > { %488 = vmatmul.mubr.f32.gmra.mxu0 %v322_v18  ;;  %1074 = vmatmul.mubr.f32.gmra.mxu1 %v325_v26 }
  0xa0   : > { %493 = vmatprep.mubr.f32.mxu0 %v1257_v5  ;;  %1076 = vmatprep.mubr.f32.mxu1 %v326_v30 }
  0xa1   : > { %v290_v33 = vpop.permute.xlu0 %289  ;;  %v292_v34 = vpop.permute.xlu1 %291 }
  0xa2   : > { %v328_v36 = vsel %vm317_vm0, %v231_v31, %v290_v33  ;;  %v329_v38 = vsel %vm317_vm0, %v232_v35, %v292_v34 }
  0xa3   : > { %494 = vmatmul.mubr.f32.gmra.mxu0 %v323_v20  ;;  %1077 = vmatmul.mubr.f32.gmra.mxu1 %v327_v32 }
  0xa4   : > { %499 = vmatprep.mubr.f32.mxu0 %v1257_v5  ;;  %1079 = vmatprep.mubr.f32.mxu1 %v328_v36 }
  0xa5   : > { %v294_v39 = vpop.permute.xlu0 %293  ;;  %v296_v40 = vpop.permute.xlu1 %295 }
  0xa6   : > { %v330_v42 = vsel %vm317_vm0, %v233_v37, %v294_v39  ;;  %v331_v44 = vsel %vm317_vm0, %v234_v41, %v296_v40 }
  0xa7   : > { %500 = vmatmul.mubr.f32.gmra.mxu0 %v324_v24  ;;  %1080 = vmatmul.mubr.f32.gmra.mxu1 %v329_v38 }
  0xa8   : > { %505 = vmatprep.mubr.f32.mxu0 %v1257_v5  ;;  %1082 = vmatprep.mubr.f32.mxu1 %v330_v42 }
  0xa9   : > { %v298_v45 = vpop.permute.xlu0 %297  ;;  %v300_v46 = vpop.permute.xlu1 %299 }
  0xaa   : > { %v332_v48 = vsel %vm317_vm0, %v235_v43, %v298_v45  ;;  %v333_v49 = vsel %vm317_vm0, %v236_v47, %v300_v46 }
  0xab   : > { %506 = vmatmul.mubr.f32.gmra.mxu0 %v325_v26  ;;  %1083 = vmatmul.mubr.f32.gmra.mxu1 %v331_v44 }
  0xac   : > { %511 = vmatprep.mubr.f32.mxu0 %v1257_v5  ;;  %1085 = vmatprep.mubr.f32.mxu1 %v332_v48 }
  0xaf   : > { %512 = vmatmul.mubr.f32.gmra.mxu0 %v326_v30  ;;  %1086 = vmatmul.mubr.f32.gmra.mxu1 %v333_v49 }
  0xb0   : > { %517 = vmatprep.mubr.f32.mxu0 %v1257_v5 }
  0xb3   : > { %518 = vmatmul.mubr.f32.gmra.mxu0 %v327_v32 }
  0xb4   : > { %523 = vmatprep.mubr.f32.mxu0 %v1257_v5 }
  0xb7   : > { %524 = vmatmul.mubr.f32.gmra.mxu0 %v328_v36 }
  0xb8   : > { %529 = vmatprep.mubr.f32.mxu0 %v1257_v5 }
  0xbb   : > { %530 = vmatmul.mubr.f32.gmra.mxu0 %v329_v38 }
  0xbc   : > { %535 = vmatprep.mubr.f32.mxu0 %v1257_v5 }
  0xbf   : > { %536 = vmatmul.mubr.f32.gmra.mxu0 %v330_v42 }
  0xc0   : > { %541 = vmatprep.mubr.f32.mxu0 %v1257_v5 }
  0xc3   : > { %542 = vmatmul.mubr.f32.gmra.mxu0 %v331_v44 }
  0xc4   : > { %547 = vmatprep.mubr.f32.mxu0 %v1257_v5 }
  0xc7   : > { %548 = vmatmul.mubr.f32.gmra.mxu0 %v332_v48 }
  0xc8   : > { %553 = vmatprep.mubr.f32.mxu0 %v1257_v5 }
  0xcb   : > { %554 = vmatmul.mubr.f32.gmra.mxu0 %v333_v49 }
 0x14f   : > { %v465_v55 = vpop.f32.mrf.mxu0 }
 0x150   : > { %v466_v56 = vadd.f32 %v465_v55, %v1580_v54 }
 0x151   : > { %v467_v57 = vpop.f32.mrf.mxu0 }
 0x152   : > { %v978_v58 = vmul.f32 -1.442695, %v466_v56  ;;  %v468_v28 = vadd.f32 %v467_v57, %v1592_v19 }
 0x153   : > { %v471_v59 = vpop.f32.mrf.mxu0  ;;  %v1066_v17 = vpop.f32.mrf.mxu1 }
 0x154   : > { %1131 = vpow2.f32 %v978_v58  ;;  %v472_v60 = vadd.f32 %v471_v59, %v1580_v54  ;;  %v801_v39 = vmax.f32 %v468_v28, 0.0  ;;  %v632_v49 = vadd.f32 %v1066_v17, %v1598_v29 }
 0x155   : > { %v473_v5 = vpop.f32.mrf.mxu0  ;;  %v626_v26 = vpop.f32.mrf.mxu1 }
 0x156   : > { %v979_v61 = vmul.f32 -1.442695, %v472_v60  ;;  %v474_v32 = vadd.f32 %v473_v5, %v1592_v19  ;;  %v627_v34 = vadd.f32 %v626_v26, %v1598_v29 }
 0x157   : > { %v477_v62 = vpop.f32.mrf.mxu0  ;;  %v1069_v35 = vpop.f32.mrf.mxu1 }
 0x158   : > { %1133 = vpow2.f32 %v979_v61  ;;  %v478_v63 = vadd.f32 %v477_v62, %v1580_v54  ;;  %v802_v42 = vmax.f32 %v474_v32, 0.0  ;;  %v817_v44 = vsub.f32 %v801_v39, %v627_v34 }
 0x159   : > { %v479_v0 = vpop.f32.mrf.mxu0  ;;  %v636_v46 = vpop.f32.mrf.mxu1 }
 0x15a   : > { %v980_v1 = vmul.f32 -1.442695, %v478_v63  ;;  %v480_v45 = vadd.f32 %v479_v0, %v1592_v19  ;;  %v818_v55 = vsub.f32 %v802_v42, %v632_v49  ;;  %v637_v56 = vadd.f32 %v636_v46, %v1598_v29 }
 0x15b   : > { %v483_v2 = vpop.f32.mrf.mxu0 }
 0x15c   : > { %1135 = vpow2.f32 %v980_v1  ;;  %v484_v3 = vadd.f32 %v483_v2, %v1580_v54  ;;  %v803_v5 = vmax.f32 %v480_v45, 0.0  ;;  %v1072_v2 = vpop.f32.mrf.mxu1 }
 0x15d   : > { %v485_v4 = vpop.f32.mrf.mxu0 }
 0x15e   : > { %v981_v6 = vmul.f32 -1.442695, %v484_v3  ;;  %v486_v57 = vadd.f32 %v485_v4, %v1592_v19 }
 0x15f   : > { %v489_v7 = vpop.f32.mrf.mxu0 }
 0x160   : > { %1137 = vpow2.f32 %v981_v6  ;;  %v490_v8 = vadd.f32 %v489_v7, %v1580_v54  ;;  %v804_v4 = vmax.f32 %v486_v57, 0.0 }
 0x161   : > { %v1132_v9 = vpop.eup %1131  ;;  %v1587_v10 = vpop.f32.mrf.mxu0 }
 0x162   : > { %v753_v11 = vadd.f32 1.0, %v1132_v9  ;;  %v982_v13 = vmul.f32 -1.442695, %v490_v8  ;;  %v819_v9 = vsub.f32 %v803_v5, %v637_v56 }
 0x163   : > { %v495_v14 = vpop.f32.mrf.mxu0 }
 0x164   : > { %1139 = vrcp.f32 %v753_v11  ;;  %v496_v15 = vadd.f32 %v495_v14, %v1580_v54  ;;  %v492_v14 = vadd.f32 %v1587_v10, %v1592_v19 }
 0x165   : > { %v1134_v16 = vpop.eup %1133  ;;  %1141 = vpow2.f32 %v982_v13  ;;  %v1590_v18 = vpop.f32.mrf.mxu0  ;;  %v642_v13 = vadd.f32 %v1069_v35, %v1598_v29 }
 0x166   : > { %v754_v20 = vadd.f32 1.0, %v1134_v16  ;;  %v983_v22 = vmul.f32 -1.442695, %v496_v15  ;;  %v498_v26 = vadd.f32 %v1590_v18, %v1592_v19 }
 0x167   : > { %v501_v23 = vpop.f32.mrf.mxu0 }
 0x168   : > { %1143 = vrcp.f32 %v754_v20  ;;  %v502_v24 = vadd.f32 %v501_v23, %v1580_v54  ;;  %v646_v20 = vpop.f32.mrf.mxu1  ;;  %v806_v18 = vmax.f32 %v498_v26, 0.0 }
 0x169   : > { %v1136_v25 = vpop.eup %1135  ;;  %1145 = vpow2.f32 %v983_v22  ;;  %v1595_v27 = vpop.f32.mrf.mxu0  ;;  %v820_v22 = vsub.f32 %v804_v4, %v642_v13 }
 0x16a   : > { %v755_v30 = vadd.f32 1.0, %v1136_v25  ;;  %v984_v31 = vmul.f32 -1.442695, %v502_v24  ;;  %v1075_v32 = vpop.f32.mrf.mxu1 }
 0x16b   : > { %v507_v33 = vpop.f32.mrf.mxu0 }
 0x16c   : > { %1147 = vrcp.f32 %v755_v30  ;;  %v508_v36 = vadd.f32 %v507_v33, %v1580_v54  ;;  %v805_v30 = vmax.f32 %v492_v14, 0.0  ;;  %v656_v45 = vpop.f32.mrf.mxu1 }
 0x16d   : > { %v1138_v37 = vpop.eup %1137  ;;  %1149 = vpow2.f32 %v984_v31  ;;  %v1604_v38 = vpop.f32.mrf.mxu0  ;;  %v647_v31 = vadd.f32 %v646_v20, %v1598_v29 }
 0x16e   : > { %v756_v40 = vadd.f32 1.0, %v1138_v37  ;;  %v985_v41 = vmul.f32 -1.442695, %v508_v36  ;;  %v1078_v57 = vpop.f32.mrf.mxu1  ;;  %v510_v5 = vadd.f32 %v1604_v38, %v1592_v19 }
 0x16f   : > { %v513_v43 = vpop.f32.mrf.mxu0 }
 0x170   : > { %1151 = vrcp.f32 %v756_v40  ;;  %v514_v47 = vadd.f32 %v513_v43, %v1580_v54  ;;  %v821_v43 = vsub.f32 %v805_v30, %v647_v31 }
 0x171   : > { %v1140_v48 = vpop.eup %1139  ;;  %1153 = vpow2.f32 %v985_v41  ;;  %v1611_v50 = vpop.f32.mrf.mxu0 }
 0x172   : > { %v1142_v51 = vpop.eup %1141  ;;  %v833_v52 = vmul.f32 %v1140_v48, %v817_v44  ;;  %v986_v53 = vmul.f32 -1.442695, %v514_v47  ;;  %v504_v44 = vadd.f32 %v1595_v27, %v1592_v19  ;;  %v652_v48 = vadd.f32 %v1072_v2, %v1598_v29 }
 0x173   : > { %v757_v58 = vadd.f32 1.0, %v1142_v51  ;;  %v519_v59 = vpop.f32.mrf.mxu0  ;;  %v516_v4 = vadd.f32 %v1611_v50, %v1592_v19 }
 0x174   : > { %v849_v60 = vadd.f32 %v833_v52, %v627_v34  ;;  %1155 = vpow2.f32 %v986_v53  ;;  %v520_v61 = vadd.f32 %v519_v59, %v1580_v54 }
 0x175   : > { %v1144_v62 = vpop.eup %1143  ;;  %1157 = vrcp.f32 %v757_v58  ;;  %v1616_v63 = vpop.f32.mrf.mxu0 }
 0x176   : > { %v1146_v0 = vpop.eup %1145  ;;  %v834_v1 = vmul.f32 %v1144_v62, %v818_v55  ;;  %865 = vst [vmem:[%s1618_s11] sm:$0xff] %v849_v60  ;;  %v987_v3 = vmul.f32 -1.442695, %v520_v61  ;;  %v822_v55 = vsub.f32 %v806_v18, %v652_v48  ;;  %v807_v60 = vmax.f32 %v504_v44, 0.0 }
 0x177   : > { %v758_v6 = vadd.f32 1.0, %v1146_v0  ;;  %v525_v7 = vpop.f32.mrf.mxu0  ;;  %v672_v18 = vadd.f32 %v1078_v57, %v1598_v29 }
 0x178   : > { %v850_v8 = vadd.f32 %v834_v1, %v632_v49  ;;  %1159 = vpow2.f32 %v987_v3  ;;  %v526_v11 = vadd.f32 %v525_v7, %v1580_v54 }
 0x179   : > { %v1148_v12 = vpop.eup %1147  ;;  %1161 = vrcp.f32 %v758_v6  ;;  %v1625_v15 = vpop.f32.mrf.mxu0 }
 0x17a   : > { %v1150_v16 = vpop.eup %1149  ;;  %866 = vst [vmem:[%s1618_s11 + $0x8] sm:$0xff] %v850_v8  ;;  %v835_v17 = vmul.f32 %v1148_v12, %v819_v9  ;;  %v988_v21 = vmul.f32 -1.442695, %v526_v11  ;;  %v666_v6 = vpop.f32.mrf.mxu1  ;;  %v808_v11 = vmax.f32 %v510_v5, 0.0 }
 0x17b   : > { %v759_v23 = vadd.f32 1.0, %v1150_v16  ;;  %v531_v24 = vpop.f32.mrf.mxu0  ;;  %v667_v50 = vadd.f32 %v666_v6, %v1598_v29 }
 0x17c   : > { %v851_v25 = vadd.f32 %v835_v17, %v637_v56  ;;  %1163 = vpow2.f32 %v988_v21  ;;  %v532_v28 = vadd.f32 %v531_v24, %v1580_v54  ;;  %v657_v56 = vadd.f32 %v656_v45, %v1598_v29  ;;  %v1081_v24 = vpop.f32.mrf.mxu1 }
 0x17d   : > { %v1152_v10 = vpop.eup %1151  ;;  %1165 = vrcp.f32 %v759_v23  ;;  %v1632_v33 = vpop.f32.mrf.mxu0  ;;  %v662_v17 = vadd.f32 %v1075_v32, %v1598_v29  ;;  %v522_v23 = vadd.f32 %v1616_v63, %v1592_v19 }
 0x17e   : > { %v1154_v34 = vpop.eup %1153  ;;  %867 = vst [vmem:[%s1618_s11 + $0x10] sm:$0xff] %v851_v25  ;;  %v836_v35 = vmul.f32 %v1152_v10, %v820_v22  ;;  %v989_v36 = vmul.f32 -1.442695, %v532_v28  ;;  %v823_v38 = vsub.f32 %v807_v60, %v657_v56  ;;  %v809_v22 = vmax.f32 %v516_v4, 0.0  ;;  %v676_v63 = vpop.f32.mrf.mxu1 }
 0x17f   : > { %v760_v37 = vadd.f32 1.0, %v1154_v34  ;;  %v537_v39 = vpop.f32.mrf.mxu0  ;;  %v824_v10 = vsub.f32 %v808_v11, %v662_v17 }
 0x180   : > { %v852_v40 = vadd.f32 %v836_v35, %v642_v13  ;;  %1167 = vpow2.f32 %v989_v36  ;;  %v538_v41 = vadd.f32 %v537_v39, %v1580_v54  ;;  %v825_v35 = vsub.f32 %v809_v22, %v667_v50 }
 0x181   : > { %v1156_v42 = vpop.eup %1155  ;;  %1169 = vrcp.f32 %v760_v37  ;;  %v1638_v46 = vpop.f32.mrf.mxu0  ;;  %v810_v36 = vmax.f32 %v522_v23, 0.0  ;;  %v528_v37 = vadd.f32 %v1625_v15, %v1592_v19  ;;  %v534_v15 = vadd.f32 %v1632_v33, %v1592_v19 }
 0x182   : > { %v1158_v47 = vpop.eup %1157  ;;  %868 = vst [vmem:[%s1618_s11 + $0x18] sm:$0xff] %v852_v40  ;;  %v761_v49 = vadd.f32 1.0, %v1156_v42  ;;  %v990_v51 = vmul.f32 -1.442695, %v538_v41  ;;  %v677_v42 = vadd.f32 %v676_v63, %v1598_v29  ;;  %v682_v33 = vadd.f32 %v1081_v24, %v1598_v29 }
 0x183   : > { %v837_v52 = vmul.f32 %v1158_v47, %v821_v43  ;;  %v543_v53 = vpop.f32.mrf.mxu0  ;;  %v826_v45 = vsub.f32 %v810_v36, %v672_v18  ;;  %v811_v47 = vmax.f32 %v528_v37, 0.0  ;;  %v812_v57 = vmax.f32 %v534_v15, 0.0 }
 0x184   : > { %1171 = vrcp.f32 %v761_v49  ;;  %v544_v27 = vadd.f32 %v543_v53, %v1580_v54 }
 0x185   : > { %v1160_v58 = vpop.eup %1159  ;;  %v853_v59 = vadd.f32 %v837_v52, %v647_v31  ;;  %1173 = vpow2.f32 %v990_v51  ;;  %v1646_v61 = vpop.f32.mrf.mxu0 }
 0x186   : > { %v1162_v62 = vpop.eup %1161  ;;  %v762_v0 = vadd.f32 1.0, %v1160_v58  ;;  %v991_v1 = vmul.f32 -1.442695, %v544_v27  ;;  %v1084_v52 = vpop.f32.mrf.mxu1  ;;  %v540_v58 = vadd.f32 %v1638_v46, %v1592_v19  ;;  %v546_v6 = vadd.f32 %v1646_v61, %v1592_v19 }
 0x187   : > { %869 = vst [vmem:[%s1618_s11 + $0x20] sm:$0xff] %v853_v59  ;;  %v838_v2 = vmul.f32 %v1162_v62, %v822_v55  ;;  %v549_v3 = vpop.f32.mrf.mxu0  ;;  %v692_v61 = vadd.f32 %v1084_v52, %v1598_v29 }
 0x188   : > { %1175 = vrcp.f32 %v762_v0  ;;  %v550_v7 = vadd.f32 %v549_v3, %v1580_v54  ;;  %v686_v5 = vpop.f32.mrf.mxu1  ;;  %v813_v3 = vmax.f32 %v540_v58, 0.0 }
 0x189   : > { %v1164_v8 = vpop.eup %1163  ;;  %v854_v9 = vadd.f32 %v838_v2, %v652_v48  ;;  %1177 = vpow2.f32 %v991_v1  ;;  %v1652_v12 = vpop.f32.mrf.mxu0  ;;  %v828_v1 = vsub.f32 %v812_v57, %v682_v33  ;;  %v687_v4 = vadd.f32 %v686_v5, %v1598_v29 }
 0x18a   : > { %v1166_v13 = vpop.eup %1165  ;;  %v763_v14 = vadd.f32 1.0, %v1164_v8  ;;  %v992_v16 = vmul.f32 -1.442695, %v550_v7  ;;  %v1087_v46 = vpop.f32.mrf.mxu1 }
 0x18b   : > { %870 = vst [vmem:[%s1618_s11 + $0x28] sm:$0xff] %v854_v9  ;;  %v839_v20 = vmul.f32 %v1166_v13, %v823_v38  ;;  %v555_v21 = vpop.f32.mrf.mxu0  ;;  %v829_v11 = vsub.f32 %v813_v3, %v687_v4  ;;  %v814_v13 = vmax.f32 %v546_v6, 0.0 }
 0x18c   : > { %1179 = vrcp.f32 %v763_v14  ;;  %v556_v25 = vadd.f32 %v555_v21, %v1580_v54  ;;  %v552_v14 = vadd.f32 %v1652_v12, %v1592_v19 }
 0x18d   : > { %v1168_v26 = vpop.eup %1167  ;;  %v855_v28 = vadd.f32 %v839_v20, %v657_v56  ;;  %1181 = vpow2.f32 %v992_v16  ;;  %v827_v56 = vsub.f32 %v811_v47, %v677_v42  ;;  %v696_v16 = vpop.f32.mrf.mxu1  ;;  %v830_v23 = vsub.f32 %v814_v13, %v692_v61 }
 0x18e   : > { %v1170_v30 = vpop.eup %1169  ;;  %v764_v31 = vadd.f32 1.0, %v1168_v26  ;;  %v993_v32 = vmul.f32 -1.442695, %v556_v25  ;;  %v557_v20 = vpop.f32.mrf.mxu0  ;;  %v697_v21 = vadd.f32 %v696_v16, %v1598_v29  ;;  %v815_v24 = vmax.f32 %v552_v14, 0.0 }
 0x18f   : > { %871 = vst [vmem:[%s1618_s11 + $0x30] sm:$0xff] %v855_v28  ;;  %v840_v34 = vmul.f32 %v1170_v30, %v824_v10  ;;  %v558_v25 = vadd.f32 %v557_v20, %v1592_v19 }
 0x190   : > { %1183 = vrcp.f32 %v764_v31  ;;  %v831_v10 = vsub.f32 %v815_v24, %v697_v21 }
 0x191   : > { %v1172_v39 = vpop.eup %1171  ;;  %v856_v54 = vadd.f32 %v840_v34, %v662_v17  ;;  %1185 = vpow2.f32 %v993_v32  ;;  %v816_v30 = vmax.f32 %v558_v25, 0.0  ;;  %v702_v32 = vadd.f32 %v1087_v46, %v1598_v29 }
 0x192   : > { %v1174_v40 = vpop.eup %1173  ;;  %v841_v41 = vmul.f32 %v1172_v39, %v825_v35 }
 0x193   : > { %872 = vst [vmem:[%s1618_s11 + $0x38] sm:$0xff] %v856_v54  ;;  %v765_v43 = vadd.f32 1.0, %v1174_v40  ;;  %v832_v36 = vsub.f32 %v816_v30, %v702_v32 }
 0x194   : > { %v857_v44 = vadd.f32 %v841_v41, %v667_v50 }
 0x195   : > { %v1176_v48 = vpop.eup %1175  ;;  %1187 = vrcp.f32 %v765_v43 }
 0x196   : > { %v1178_v49 = vpop.eup %1177  ;;  %873 = vst [vmem:[%s1618_s11 + $0x40] sm:$0xff] %v857_v44  ;;  %v842_v51 = vmul.f32 %v1176_v48, %v826_v45 }
 0x197   : > { %v766_v53 = vadd.f32 1.0, %v1178_v49 }
 0x198   : > { %v858_v55 = vadd.f32 %v842_v51, %v672_v18 }
 0x199   : > { %v1180_v27 = vpop.eup %1179  ;;  %1189 = vrcp.f32 %v766_v53 }
 0x19a   : > { %v1182_v59 = vpop.eup %1181  ;;  %874 = vst [vmem:[%s1618_s11 + $0x48] sm:$0xff] %v858_v55  ;;  %v843_v60 = vmul.f32 %v1180_v27, %v827_v56 }
 0x19b   : > { %v767_v62 = vadd.f32 1.0, %v1182_v59 }
 0x19c   : > { %v859_v0 = vadd.f32 %v843_v60, %v677_v42 }
 0x19d   : > { %v1184_v2 = vpop.eup %1183  ;;  %1191 = vrcp.f32 %v767_v62 }
 0x19e   : > { %v1186_v7 = vpop.eup %1185  ;;  %875 = vst [vmem:[%s1618_s11 + $0x50] sm:$0xff] %v859_v0  ;;  %v844_v8 = vmul.f32 %v1184_v2, %v828_v1 }
 0x19f   : > { %v768_v9 = vadd.f32 1.0, %v1186_v7 }
 0x1a0   : > { %v860_v38 = vadd.f32 %v844_v8, %v682_v33 }
 0x1a1   : > { %1193 = vrcp.f32 %v768_v9 }
 0x1a2   : > { %v1188_v17 = vpop.eup %1187  ;;  %876 = vst [vmem:[%s1618_s11 + $0x58] sm:$0xff] %v860_v38 }
 0x1a3   : > { %v845_v50 = vmul.f32 %v1188_v17, %v829_v11 }
 0x1a5   : > { %v861_v22 = vadd.f32 %v845_v50, %v687_v4 }
 0x1a6   : > { %v1190_v12 = vpop.eup %1189 }
 0x1a7   : > { %877 = vst [vmem:[%s1618_s11 + $0x60] sm:$0xff] %v861_v22  ;;  %v846_v26 = vmul.f32 %v1190_v12, %v830_v23 }
 0x1a9   : > { %v862_v28 = vadd.f32 %v846_v26, %v692_v61 }
 0x1aa   : > { %v1192_v31 = vpop.eup %1191 }
 0x1ab   : > { %878 = vst [vmem:[%s1618_s11 + $0x68] sm:$0xff] %v862_v28  ;;  %v847_v34 = vmul.f32 %v1192_v31, %v831_v10 }
 0x1ad   : > { %v863_v35 = vadd.f32 %v847_v34, %v697_v21 }
 0x1ae   : > { %v1194_v19 = vpop.eup %1193 }
 0x1af   : > { %879 = vst [vmem:[%s1618_s11 + $0x70] sm:$0xff] %v863_v35  ;;  %v848_v37 = vmul.f32 %v1194_v19, %v832_v36 }
 0x1b1   : > { %v864_v29 = vadd.f32 %v848_v37, %v702_v32 }
 0x1b3   : > { %880 = vst [vmem:[%s1618_s11 + $0x78] sm:$0xff] %v864_v29 }
 0x1b4   : > { %1208 = shalt.err (!%p1205_p3)
}
 0x1b5   : > { %s1209_s22 = scalar_lea.hbm %s1692_s20, 2048  ;;  %s1213_s27 = scalar_lea.hbm %s1743_s4, 4096 }
 0x1b6   : > { %p1210_p4 = scmp.ne.s32.totalorder %s1692_s20, %s1209_s22  ;;  %p1214_p9 = scmp.lt.s32.totalorder %s1692_s20, %s1743_s4 }
 0x1b7   : > { %p1215_p10 = scmp.lt.s32.totalorder %s1213_s27, %s1209_s22 }
 0x1b8   : > { %p1211_p7 = pnand %p1210_p4, %p1325_p5 }
 0x1b9   : > { %p1216_p11 = por %p1215_p10, %p1214_p9 }
 0x1ba   : > { %p1212_p8 = pneg %p1211_p7 }
 0x1bc   : > { %p1217_p12 = pnand %p1216_p11, %p1212_p8 }
 0x1be   : > { %1220 = shalt.err (!%p1217_p12)
}
 0x1bf   : > { %s1260_s10 = smov 128   ;;  %s1261_s11 = smov 8  }
 0x1c0   : > { %1088 = dma.vmem_to_hbm [thread:$0]  (%p1325_p5), %s1694_s13, 2048, %s1692_s20, %s1699_s23, %s1260_s10, %s1260_s10, %s1261_s11  }
 0x1c1 PF: > { %p1094_p13 = scmp.ge.s32.totalorder %s1255_s18, 2  ;;  %s910_s12 = sand.u32 1, %s1243_s15  }
 0x1c2   : > { %s911_s14 = scalar_lea.sflag [#allocation3], %s910_s12 }
 0x1c3   : > { %p1091_p0 = pnand %p1094_p13, %p1329_p6 }
 0x1c5   : > { %p1092_p1 = pneg %p1091_p0 }
 0x1c7   : > { %1238 = dma.done.wait (%p1092_p1), %s911_s14, 2048  }
 0x1c8   : > { %1240 = vsyncadd (%p1092_p1), %s911_s14, 4294965248  ;;  %p14_p2 = scmp.ge.s32.totalorder %s1312_s21, 4   ;;  %s1746_s15 = smov %s1247_s16 }
 0x1c9   : > { %s1747_s16 = smov %s1251_s17  ;;  %s1748_s17 = smov %s1323_s24 }
 0x1ca   : > { %s1749_s18 = smov %s1312_s21  ;;  %16 = sbr.rel (!%p14_p2) target bundleno = 3 (0x3), region = 74 }
 0x1cf   :  { %916 = vsyncpa [#allocation3], 1 }
 0x1d0   :  { %918 = vsyncpa [#allocation3 + $0x1], 1 }

// kernel: tpu_custom_call.1
= control target key start
LH: loop header
LB: loop body
LE: loop exit
PB: predicated region body
PF: predicated region fallthrough
CT: control target
= control target key end

     0   :  { %9 = vsyncpa [#allocation3], 0  ;;  %s1739_s0 = inlined_call_operand.vmem [shape: f32[256,64], index: 0, kind: input, shape index: {}]   ;;  %s1740_s1 = inlined_call_operand.vmem [shape: f32[256,64], index: 1, kind: input, shape index: {}]   ;;  %s1741_s2 = inlined_call_operand.vmem [shape: f32[128,384], index: 2, kind: input, shape index: {}]   ;;  %s1742_s3 = inlined_call_operand.vmem [shape: f32[1,384], index: 3, kind: input, shape index: {}]   ;;  %s1743_s4 = inlined_call_operand.hbm [shape: f32[256,128], index: 4, kind: output, shape index: {}]  }
   0x1   :  { %11 = vsyncpa [#allocation3 + $0x1], 0  ;;  %s1287_s15 = smov 0   ;;  %s1289_s16 = smov 0  }
   0x2   :  { %s1291_s17 = smov 0   ;;  %s1293_s18 = smov 0  }
   0x3 LB: > { %s1308_s19 = sadd.s32 4294967295, %s1255_s18   ;;  %s969_s20 = sadd.s32 4294967294, %s1255_s18   ;;  %s1255_s18 = sphi %s1293_s18, %s1749_s18   ;;  %s1251_s17 = sphi %s1291_s17, %s1748_s17   ;;  %s1247_s16 = sphi %s1289_s16, %s1747_s16   ;;  %s1243_s15 = sphi %s1287_s15, %s1746_s15  }
   0x4   : > { %s1312_s21 = sadd.s32 1, %s1255_s18   ;;  %s118_s22 = sadd.s32 1, %s1251_s17 }
   0x5   : > { %s115_s23 = ssub.s32 %s1255_s18, %s1312_s21  ;;  %p128_p0 = scmp.ne.s32.totalorder %s1251_s17, %s1247_s16 }
   0x6   : > { %p116_p1 = scmp.eq.s32.totalorder %s115_s23, 0  ;;  %p129_p2 = scmp.eq.s32.totalorder %s1308_s19, 1 }
   0x7   : > { %p134_p3 = scmp.ne.s32.totalorder %s1247_s16, %s1243_s15  ;;  %p135_p4 = scmp.eq.s32.totalorder %s969_s20, 1 }
   0x8   : > { %s1323_s24 = scalar_select %p116_p1, %s1251_s17, %s118_s22  }
   0x9   : > { %p1325_p5 = por %p129_p2, %p128_p0  ;;  %p1329_p6 = por %p135_p4, %p134_p3 }
   0xa   : > { %p972_p7 = scmp.ge.s32.totalorder %s1255_s18, 1  ;;  %p177_p8 = scmp.lt.s32.totalorder %s1255_s18, 3 }
   0xc   : > { %p178_p9 = pnand %p972_p7, %p177_p8 }
   0xd   : > { %s974_s27 = sshll.u32 (!%p178_p9), %s1308_s19, 4  ;;  %s1258_s22 = smov (!%p178_p9), 64  }
   0xe   : > { %181 = sbr.rel (%p178_p9) target bundleno = 449 (0x1c1), region = 36  ;;  %p209_p10 = scmp.lt.s32.totalorder (!%p178_p9), %s974_s27, 31 }
   0xf   : > { %s205_s8 = sand.u32 (!%p178_p9), 1, %s1247_s16   ;;  %s999_s12 = sshll.u32 (!%p178_p9), %s1308_s19, 11 }
  0x10   : > { %s973_s10 = sshll.u32 (!%p178_p9), %s205_s8, 7  ;;  %s1692_s20 = scalar_lea.hbm (!%p178_p9), %s1743_s4, %s999_s12 }
  0x11   : > { %s1618_s11 = scalar_lea.vmem (!%p178_p9), [#allocation2], %s973_s10  ;;  %s1699_s23 = scalar_lea.sflag (!%p178_p9), [#allocation3], %s205_s8 }
  0x12   : > { %s895_s13 = sshll.u32 (!%p178_p9), %s1618_s11, 4  ;;  %s1259_s28 = smov (!%p178_p9), [#allocation2]   ;;  %s1694_s13 = int_to_ptr.vmem [resolvable:$true] %s895_s13 }
  0x13   : > { %v380_v0 = vld [vmem:[%s1741_s2 + $0x170] sm:$0xff]  ;;  %v379_v1 = vld [vmem:[%s1741_s2 + $0x168] sm:$0xff]  ;;  %v377_v2 = vld [vmem:[%s1741_s2 + $0x158] sm:$0xff]  ;;  %v1257_v5 = vmov 0.0   ;;  %s1751_s27 = smov (!%p209_p10, %s974_s27), 31  ;;  %vm317_vm0 = vcmask 523264  }
  0x14   : > { %399 = vmatprep.subr.mxu0 %v380_v0  ;;  %v376_v3 = vld [vmem:[%s1741_s2 + $0x150] sm:$0xff]  ;;  %v381_v4 = vld [vmem:[%s1741_s2 + $0x178] sm:$0xff]  ;;  %463 = vmatprep.mubr.f32.mxu0 %v1257_v5  ;;  %v374_v6 = vld [vmem:[%s1741_s2 + $0x140] sm:$0xff]  ;;  %s975_s6 = sshll.u32 %s1751_s27, 3  ;;  %s1195_s19 = scalar_lea.vmem %s1694_s13, 2048 }
  0x15   : > { %400 = vmatpush1.msra.mxu0 %v379_v1  ;;  %1032 = vmatprep.subr.mxu1 %v381_v4  ;;  %v378_v7 = vld [vmem:[%s1741_s2 + $0x160] sm:$0xff]  ;;  %v373_v8 = vld [vmem:[%s1741_s2 + $0x138] sm:$0xff]  ;;  %v375_v9 = vld [vmem:[%s1741_s2 + $0x148] sm:$0xff]  ;;  %s1375_s9 = scalar_lea.vmem %s1740_s1, %s975_s6  ;;  %s1528_s7 = scalar_lea.vmem %s1739_s0, %s975_s6 }
  0x16   : > { %401 = vmatprep.subr.mxu0 %v377_v2  ;;  %1033 = vmatpush3.msra.mxu1 %v381_v4  ;;  %v371_v10 = vld [vmem:[%s1741_s2 + $0x128] sm:$0xff]  ;;  %v370_v11 = vld [vmem:[%s1741_s2 + $0x120] sm:$0xff]  ;;  %v372_v12 = vld [vmem:[%s1741_s2 + $0x130] sm:$0xff]  ;;  %p1196_p11 = scmp.ne.s32.totalorder %s1694_s13, %s1195_s19  ;;  %s1199_s29 = sshll.u32 %s1259_s28, 4  ;;  %s1200_s29 = int_to_ptr.vmem [resolvable:$false] %s1199_s29 }
  0x17   : > { %402 = vmatpush1.msra.mxu0 %v376_v3  ;;  %1034 = vmatprep.subr.mxu1 %v378_v7  ;;  %v237_v13 = vld [vmem:[%s1375_s9] sm:$0xff]  ;;  %v239_v14 = vld [vmem:[%s1375_s9 + $0x10] sm:$0xff]  ;;  %v367_v16 = vld [vmem:[%s1741_s2 + $0x108] sm:$0xff]  ;;  %s1201_s30 = scalar_lea.vmem %s1200_s29, 4096  ;;  %p1202_p0 = scmp.lt.s32.totalorder %s1694_s13, %s1200_s29 }
  0x18   : > { %403 = vmatprep.subr.mxu0 %v374_v6  ;;  %1035 = vmatpush3.msra.mxu1 %v378_v7  ;;  %v368_v15 = vld [vmem:[%s1741_s2 + $0x110] sm:$0xff]  ;;  %v369_v17 = vld [vmem:[%s1741_s2 + $0x118] sm:$0xff]  ;;  %v238_v18 = vld [vmem:[%s1375_s9 + $0x8] sm:$0xff]  ;;  %p1197_p12 = pnand %p1196_p11, %p1325_p5  ;;  %p1203_p1 = scmp.lt.s32.totalorder %s1201_s30, %s1195_s19 }
  0x19   : > { %404 = vmatpush1.msra.mxu0 %v373_v8  ;;  %1036 = vmatprep.subr.mxu1 %v375_v9  ;;  %v240_v19 = vld [vmem:[%s1375_s9 + $0x18] sm:$0xff]  ;;  %v364_v21 = vld [vmem:[%s1741_s2 + $0xf0] sm:$0xff]  ;;  %v366_v22 = vld [vmem:[%s1741_s2 + $0x100] sm:$0xff] }
  0x1a   : > { %405 = vmatprep.subr.mxu0 %v371_v10  ;;  %1037 = vmatpush3.msra.mxu1 %v375_v9  ;;  %v365_v20 = vld [vmem:[%s1741_s2 + $0xf8] sm:$0xff]  ;;  %v362_v23 = vld [vmem:[%s1741_s2 + $0xe0] sm:$0xff]  ;;  %v242_v25 = vld [vmem:[%s1375_s9 + $0x28] sm:$0xff]  ;;  %p1198_p13 = pneg %p1197_p12  ;;  %p1204_p2 = por %p1203_p1, %p1202_p0 }
  0x1b   : > { %269 = vrot.lane.b32.xlu0 %v237_v13, %s1258_s22  ;;  %273 = vrot.lane.b32.xlu1 %v239_v14, %s1258_s22  ;;  %v241_v24 = vld [vmem:[%s1375_s9 + $0x20] sm:$0xff]  ;;  %v361_v26 = vld [vmem:[%s1741_s2 + $0xd8] sm:$0xff] }
  0x1c   : > { %406 = vmatpush1.msra.mxu0 %v370_v11  ;;  %1038 = vmatprep.subr.mxu1 %v372_v12  ;;  %v363_v27 = vld [vmem:[%s1741_s2 + $0xe8] sm:$0xff]  ;;  %v358_v29 = vld [vmem:[%s1741_s2 + $0xc0] sm:$0xff]  ;;  %v360_v30 = vld [vmem:[%s1741_s2 + $0xd0] sm:$0xff]  ;;  %p1205_p3 = pnand %p1204_p2, %p1198_p13 }
  0x1d   : > { %407 = vmatprep.subr.mxu0 %v368_v15  ;;  %1039 = vmatpush3.msra.mxu1 %v372_v12  ;;  %v359_v28 = vld [vmem:[%s1741_s2 + $0xc8] sm:$0xff]  ;;  %v243_v31 = vld [vmem:[%s1375_s9 + $0x30] sm:$0xff]  ;;  %v244_v32 = vld [vmem:[%s1375_s9 + $0x38] sm:$0xff] }
  0x1e   : > { %408 = vmatpush1.msra.mxu0 %v367_v16  ;;  %1040 = vmatprep.subr.mxu1 %v369_v17  ;;  %v356_v33 = vld [vmem:[%s1741_s2 + $0xb0] sm:$0xff]  ;;  %v355_v34 = vld [vmem:[%s1741_s2 + $0xa8] sm:$0xff]  ;;  %v357_v35 = vld [vmem:[%s1741_s2 + $0xb8] sm:$0xff] }
  0x1f   : > { %271 = vrot.lane.b32.xlu0 %v238_v18, %s1258_s22  ;;  %275 = vrot.lane.b32.xlu1 %v240_v19, %s1258_s22  ;;  %v353_v36 = vld [vmem:[%s1741_s2 + $0x98] sm:$0xff]  ;;  %v245_v37 = vld [vmem:[%s1375_s9 + $0x40] sm:$0xff] }
  0x20   : > { %409 = vmatprep.subr.mxu0 %v365_v20  ;;  %1041 = vmatpush3.msra.mxu1 %v369_v17  ;;  %v246_v38 = vld [vmem:[%s1375_s9 + $0x48] sm:$0xff]  ;;  %v352_v39 = vld [vmem:[%s1741_s2 + $0x90] sm:$0xff]  ;;  %v354_v40 = vld [vmem:[%s1741_s2 + $0xa0] sm:$0xff] }
  0x21   : > { %410 = vmatpush1.msra.mxu0 %v364_v21  ;;  %1042 = vmatprep.subr.mxu1 %v366_v22  ;;  %v350_v41 = vld [vmem:[%s1741_s2 + $0x80] sm:$0xff]  ;;  %v349_v42 = vld [vmem:[%s1741_s2 + $0x78] sm:$0xff]  ;;  %v351_v43 = vld [vmem:[%s1741_s2 + $0x88] sm:$0xff] }
  0x22   : > { %411 = vmatprep.subr.mxu0 %v362_v23  ;;  %1043 = vmatpush3.msra.mxu1 %v366_v22  ;;  %v247_v44 = vld [vmem:[%s1375_s9 + $0x50] sm:$0xff]  ;;  %v248_v45 = vld [vmem:[%s1375_s9 + $0x58] sm:$0xff]  ;;  %v347_v46 = vld [vmem:[%s1741_s2 + $0x68] sm:$0xff] }
  0x23   : > { %277 = vrot.lane.b32.xlu0 %v241_v24, %s1258_s22  ;;  %279 = vrot.lane.b32.xlu1 %v242_v25, %s1258_s22  ;;  %v346_v47 = vld [vmem:[%s1741_s2 + $0x60] sm:$0xff]  ;;  %v348_v48 = vld [vmem:[%s1741_s2 + $0x70] sm:$0xff] }
  0x24   : > { %412 = vmatpush1.msra.mxu0 %v361_v26  ;;  %1044 = vmatprep.subr.mxu1 %v363_v27  ;;  %v344_v49 = vld [vmem:[%s1741_s2 + $0x50] sm:$0xff]  ;;  %v249_v50 = vld [vmem:[%s1375_s9 + $0x60] sm:$0xff]  ;;  %v250_v51 = vld [vmem:[%s1375_s9 + $0x68] sm:$0xff] }
  0x25   : > { %413 = vmatprep.subr.mxu0 %v359_v28  ;;  %1045 = vmatpush3.msra.mxu1 %v363_v27  ;;  %v343_v52 = vld [vmem:[%s1741_s2 + $0x48] sm:$0xff]  ;;  %v345_v53 = vld [vmem:[%s1741_s2 + $0x58] sm:$0xff]  ;;  %v340_v55 = vld [vmem:[%s1741_s2 + $0x30] sm:$0xff] }
  0x26   : > { %414 = vmatpush1.msra.mxu0 %v358_v29  ;;  %1046 = vmatprep.subr.mxu1 %v360_v30  ;;  %v341_v54 = vld [vmem:[%s1741_s2 + $0x38] sm:$0xff]  ;;  %v342_v56 = vld [vmem:[%s1741_s2 + $0x40] sm:$0xff]  ;;  %v251_v57 = vld [vmem:[%s1375_s9 + $0x70] sm:$0xff] }
  0x27   : > { %281 = vrot.lane.b32.xlu0 %v243_v31, %s1258_s22  ;;  %283 = vrot.lane.b32.xlu1 %v244_v32, %s1258_s22  ;;  %v252_v58 = vld [vmem:[%s1375_s9 + $0x78] sm:$0xff]  ;;  %v338_v59 = vld [vmem:[%s1741_s2 + $0x20] sm:$0xff] }
  0x28   : > { %415 = vmatprep.subr.mxu0 %v356_v33  ;;  %1047 = vmatpush3.msra.mxu1 %v360_v30  ;;  %v337_v60 = vld [vmem:[%s1741_s2 + $0x18] sm:$0xff]  ;;  %v339_v61 = vld [vmem:[%s1741_s2 + $0x28] sm:$0xff]  ;;  %v334_v63 = vld [vmem:[%s1741_s2] sm:$0xff] }
  0x29   : > { %416 = vmatpush1.msra.mxu0 %v355_v34  ;;  %1048 = vmatprep.subr.mxu1 %v357_v35  ;;  %v335_v62 = vld [vmem:[%s1741_s2 + $0x8] sm:$0xff]  ;;  %v336_v0 = vld [vmem:[%s1741_s2 + $0x10] sm:$0xff]  ;;  %v221_v1 = vld [vmem:[%s1528_s7] sm:$0xff] }
  0x2a   : > { %417 = vmatprep.subr.mxu0 %v353_v36  ;;  %1049 = vmatpush3.msra.mxu1 %v357_v35  ;;  %v223_v6 = vld [vmem:[%s1528_s7 + $0x10] sm:$0xff]  ;;  %v222_v7 = vld [vmem:[%s1528_s7 + $0x8] sm:$0xff]  ;;  %v224_v11 = vld [vmem:[%s1528_s7 + $0x18] sm:$0xff] }
  0x2b   : > { %285 = vrot.lane.b32.xlu0 %v245_v37, %s1258_s22  ;;  %287 = vrot.lane.b32.xlu1 %v246_v38, %s1258_s22  ;;  %v225_v13 = vld [vmem:[%s1528_s7 + $0x20] sm:$0xff]  ;;  %v226_v17 = vld [vmem:[%s1528_s7 + $0x28] sm:$0xff] }
  0x2c   : > { %418 = vmatpush1.msra.mxu0 %v352_v39  ;;  %1050 = vmatprep.subr.mxu1 %v354_v40  ;;  %v227_v19 = vld [vmem:[%s1528_s7 + $0x30] sm:$0xff]  ;;  %v228_v23 = vld [vmem:[%s1528_s7 + $0x38] sm:$0xff]  ;;  %v229_v25 = vld [vmem:[%s1528_s7 + $0x40] sm:$0xff] }
  0x2d   : > { %419 = vmatprep.subr.mxu0 %v350_v41  ;;  %1051 = vmatpush3.msra.mxu1 %v354_v40  ;;  %v230_v29 = vld [vmem:[%s1528_s7 + $0x48] sm:$0xff]  ;;  %v231_v31 = vld [vmem:[%s1528_s7 + $0x50] sm:$0xff]  ;;  %v232_v35 = vld [vmem:[%s1528_s7 + $0x58] sm:$0xff] }
  0x2e   : > { %420 = vmatpush1.msra.mxu0 %v349_v42  ;;  %1052 = vmatprep.subr.mxu1 %v351_v43  ;;  %v233_v37 = vld [vmem:[%s1528_s7 + $0x60] sm:$0xff]  ;;  %v234_v41 = vld [vmem:[%s1528_s7 + $0x68] sm:$0xff] }
  0x2f   : > { %289 = vrot.lane.b32.xlu0 %v247_v44, %s1258_s22  ;;  %291 = vrot.lane.b32.xlu1 %v248_v45, %s1258_s22 }
  0x30   : > { %421 = vmatprep.subr.mxu0 %v347_v46  ;;  %1053 = vmatpush3.msra.mxu1 %v351_v43  ;;  %v235_v43 = vld [vmem:[%s1528_s7 + $0x70] sm:$0xff] }
  0x31   : > { %422 = vmatpush1.msra.mxu0 %v346_v47  ;;  %1054 = vmatprep.subr.mxu1 %v348_v48  ;;  %v236_v47 = vld [vmem:[%s1528_s7 + $0x78] sm:$0xff] }
  0x32   : > { %423 = vmatprep.subr.mxu0 %v344_v49  ;;  %1055 = vmatpush3.msra.mxu1 %v348_v48 }
  0x33   : > { %293 = vrot.lane.b32.xlu0 %v249_v50, %s1258_s22  ;;  %295 = vrot.lane.b32.xlu1 %v250_v51, %s1258_s22  ;;  %v384_v50 = vlaneseq }
  0x34   : > { %424 = vmatpush1.msra.mxu0 %v343_v52  ;;  %1056 = vmatprep.subr.mxu1 %v345_v53 }
  0x35   : > { %425 = vmatprep.subr.mxu0 %v341_v54  ;;  %1057 = vmatpush3.msra.mxu1 %v345_v53  ;;  %v385_v51 = vshrl.u32 %v384_v50, 7  ;;  %v382_v53 = vld [vmem:[%s1742_s3] sm:$0x7] }
  0x36   : > { %426 = vmatpush1.msra.mxu0 %v340_v55  ;;  %1058 = vmatprep.subr.mxu1 %v342_v56 }
  0x37   : > { %297 = vrot.lane.b32.xlu0 %v251_v57, %s1258_s22  ;;  %299 = vrot.lane.b32.xlu1 %v252_v58, %s1258_s22  ;;  %v386_v52 = vsub.s32 0, %v385_v51 }
  0x38   : > { %427 = vmatprep.subr.mxu0 %v338_v59  ;;  %1059 = vmatpush3.msra.mxu1 %v342_v56 }
  0x39   : > { %428 = vmatpush1.msra.mxu0 %v337_v60  ;;  %1060 = vmatprep.subr.mxu1 %v339_v61  ;;  %v1580_v54 = vrot.slane %v382_v53, %v386_v52 }
  0x3a   : > { %429 = vmatprep.subr.mxu0 %v335_v62  ;;  %1061 = vmatpush3.msra.mxu1 %v339_v61 }
  0x3b   : > { %430 = vmatpush1.msra.mxu0 %v334_v63  ;;  %1062 = vmatprep.subr.mxu1 %v336_v0 }
  0x3c   : > { %1063 = vmatpush3.msra.mxu1 %v336_v0 }
  0x8d   : > { %v270_v2 = vpop.permute.xlu0 %269  ;;  %v274_v3 = vpop.permute.xlu1 %273 }
  0x8e   : > { %v318_v4 = vsel %vm317_vm0, %v221_v1, %v270_v2  ;;  %v320_v10 = vsel %vm317_vm0, %v223_v6, %v274_v3 }
  0x8f   : > { %464 = vmatmul.mubr.f32.vlgmr.msra.gmra.mxu0 %v318_v4  ;;  %1064 = vmatprep.mubr.f32.mxu1 %v318_v4 }
  0x90   : > { %469 = vmatprep.mubr.f32.mxu0 %v1257_v5 }
  0x91   : > { %v272_v8 = vpop.permute.xlu0 %271  ;;  %v276_v9 = vpop.permute.xlu1 %275 }
  0x92   : > { %v319_v12 = vsel %vm317_vm0, %v222_v7, %v272_v8  ;;  %v321_v14 = vsel %vm317_vm0, %v224_v11, %v276_v9 }
  0x93   : > { %470 = vmatmul.mubr.f32.gmra.mxu0 %v319_v12  ;;  %1065 = vmatmul.mubr.f32.vlgmr.msra.gmra.mxu1 %v319_v12  ;;  %v390_v12 = vsub.s32 1, %v385_v51 }
  0x94   : > { %475 = vmatprep.mubr.f32.mxu0 %v1257_v5  ;;  %1067 = vmatprep.mubr.f32.mxu1 %v320_v10 }
  0x95   : > { %v278_v15 = vpop.permute.xlu0 %277  ;;  %v280_v16 = vpop.permute.xlu1 %279 }
  0x96   : > { %v322_v18 = vsel %vm317_vm0, %v225_v13, %v278_v15  ;;  %v323_v20 = vsel %vm317_vm0, %v226_v17, %v280_v16 }
  0x97   : > { %476 = vmatmul.mubr.f32.gmra.mxu0 %v320_v10  ;;  %1068 = vmatmul.mubr.f32.gmra.mxu1 %v321_v14 }
  0x98   : > { %481 = vmatprep.mubr.f32.mxu0 %v1257_v5  ;;  %1070 = vmatprep.mubr.f32.mxu1 %v322_v18 }
  0x99   : > { %v282_v21 = vpop.permute.xlu0 %281  ;;  %v284_v22 = vpop.permute.xlu1 %283 }
  0x9a   : > { %v324_v24 = vsel %vm317_vm0, %v227_v19, %v282_v21  ;;  %v325_v26 = vsel %vm317_vm0, %v228_v23, %v284_v22  ;;  %v1592_v19 = vrot.slane %v382_v53, %v390_v12  ;;  %v394_v21 = vsub.s32 2, %v385_v51 }
  0x9b   : > { %482 = vmatmul.mubr.f32.gmra.mxu0 %v321_v14  ;;  %1071 = vmatmul.mubr.f32.gmra.mxu1 %v323_v20 }
  0x9c   : > { %487 = vmatprep.mubr.f32.mxu0 %v1257_v5  ;;  %1073 = vmatprep.mubr.f32.mxu1 %v324_v24 }
  0x9d   : > { %v286_v27 = vpop.permute.xlu0 %285  ;;  %v288_v28 = vpop.permute.xlu1 %287 }
  0x9e   : > { %v326_v30 = vsel %vm317_vm0, %v229_v25, %v286_v27  ;;  %v327_v32 = vsel %vm317_vm0, %v230_v29, %v288_v28  ;;  %v1598_v29 = vrot.slane %v382_v53, %v394_v21 }
  0x9f   : > { %488 = vmatmul.mubr.f32.gmra.mxu0 %v322_v18  ;;  %1074 = vmatmul.mubr.f32.gmra.mxu1 %v325_v26 }
  0xa0   : > { %493 = vmatprep.mubr.f32.mxu0 %v1257_v5  ;;  %1076 = vmatprep.mubr.f32.mxu1 %v326_v30 }
  0xa1   : > { %v290_v33 = vpop.permute.xlu0 %289  ;;  %v292_v34 = vpop.permute.xlu1 %291 }
  0xa2   : > { %v328_v36 = vsel %vm317_vm0, %v231_v31, %v290_v33  ;;  %v329_v38 = vsel %vm317_vm0, %v232_v35, %v292_v34 }
  0xa3   : > { %494 = vmatmul.mubr.f32.gmra.mxu0 %v323_v20  ;;  %1077 = vmatmul.mubr.f32.gmra.mxu1 %v327_v32 }
  0xa4   : > { %499 = vmatprep.mubr.f32.mxu0 %v1257_v5  ;;  %1079 = vmatprep.mubr.f32.mxu1 %v328_v36 }
  0xa5   : > { %v294_v39 = vpop.permute.xlu0 %293  ;;  %v296_v40 = vpop.permute.xlu1 %295 }
  0xa6   : > { %v330_v42 = vsel %vm317_vm0, %v233_v37, %v294_v39  ;;  %v331_v44 = vsel %vm317_vm0, %v234_v41, %v296_v40 }
  0xa7   : > { %500 = vmatmul.mubr.f32.gmra.mxu0 %v324_v24  ;;  %1080 = vmatmul.mubr.f32.gmra.mxu1 %v329_v38 }
  0xa8   : > { %505 = vmatprep.mubr.f32.mxu0 %v1257_v5  ;;  %1082 = vmatprep.mubr.f32.mxu1 %v330_v42 }
  0xa9   : > { %v298_v45 = vpop.permute.xlu0 %297  ;;  %v300_v46 = vpop.permute.xlu1 %299 }
  0xaa   : > { %v332_v48 = vsel %vm317_vm0, %v235_v43, %v298_v45  ;;  %v333_v49 = vsel %vm317_vm0, %v236_v47, %v300_v46 }
  0xab   : > { %506 = vmatmul.mubr.f32.gmra.mxu0 %v325_v26  ;;  %1083 = vmatmul.mubr.f32.gmra.mxu1 %v331_v44 }
  0xac   : > { %511 = vmatprep.mubr.f32.mxu0 %v1257_v5  ;;  %1085 = vmatprep.mubr.f32.mxu1 %v332_v48 }
  0xaf   : > { %512 = vmatmul.mubr.f32.gmra.mxu0 %v326_v30  ;;  %1086 = vmatmul.mubr.f32.gmra.mxu1 %v333_v49 }
  0xb0   : > { %517 = vmatprep.mubr.f32.mxu0 %v1257_v5 }
  0xb3   : > { %518 = vmatmul.mubr.f32.gmra.mxu0 %v327_v32 }
  0xb4   : > { %523 = vmatprep.mubr.f32.mxu0 %v1257_v5 }
  0xb7   : > { %524 = vmatmul.mubr.f32.gmra.mxu0 %v328_v36 }
  0xb8   : > { %529 = vmatprep.mubr.f32.mxu0 %v1257_v5 }
  0xbb   : > { %530 = vmatmul.mubr.f32.gmra.mxu0 %v329_v38 }
  0xbc   : > { %535 = vmatprep.mubr.f32.mxu0 %v1257_v5 }
  0xbf   : > { %536 = vmatmul.mubr.f32.gmra.mxu0 %v330_v42 }
  0xc0   : > { %541 = vmatprep.mubr.f32.mxu0 %v1257_v5 }
  0xc3   : > { %542 = vmatmul.mubr.f32.gmra.mxu0 %v331_v44 }
  0xc4   : > { %547 = vmatprep.mubr.f32.mxu0 %v1257_v5 }
  0xc7   : > { %548 = vmatmul.mubr.f32.gmra.mxu0 %v332_v48 }
  0xc8   : > { %553 = vmatprep.mubr.f32.mxu0 %v1257_v5 }
  0xcb   : > { %554 = vmatmul.mubr.f32.gmra.mxu0 %v333_v49 }
 0x14f   : > { %v465_v55 = vpop.f32.mrf.mxu0 }
 0x150   : > { %v466_v56 = vadd.f32 %v465_v55, %v1580_v54 }
 0x151   : > { %v467_v57 = vpop.f32.mrf.mxu0 }
 0x152   : > { %v978_v58 = vmul.f32 -1.442695, %v466_v56  ;;  %v468_v28 = vadd.f32 %v467_v57, %v1592_v19 }
 0x153   : > { %v471_v59 = vpop.f32.mrf.mxu0  ;;  %v1066_v17 = vpop.f32.mrf.mxu1 }
 0x154   : > { %1131 = vpow2.f32 %v978_v58  ;;  %v472_v60 = vadd.f32 %v471_v59, %v1580_v54  ;;  %v801_v39 = vmax.f32 %v468_v28, 0.0  ;;  %v632_v49 = vadd.f32 %v1066_v17, %v1598_v29 }
 0x155   : > { %v473_v5 = vpop.f32.mrf.mxu0  ;;  %v626_v26 = vpop.f32.mrf.mxu1 }
 0x156   : > { %v979_v61 = vmul.f32 -1.442695, %v472_v60  ;;  %v474_v32 = vadd.f32 %v473_v5, %v1592_v19  ;;  %v627_v34 = vadd.f32 %v626_v26, %v1598_v29 }
 0x157   : > { %v477_v62 = vpop.f32.mrf.mxu0  ;;  %v1069_v35 = vpop.f32.mrf.mxu1 }
 0x158   : > { %1133 = vpow2.f32 %v979_v61  ;;  %v478_v63 = vadd.f32 %v477_v62, %v1580_v54  ;;  %v802_v42 = vmax.f32 %v474_v32, 0.0  ;;  %v817_v44 = vsub.f32 %v801_v39, %v627_v34 }
 0x159   : > { %v479_v0 = vpop.f32.mrf.mxu0  ;;  %v636_v46 = vpop.f32.mrf.mxu1 }
 0x15a   : > { %v980_v1 = vmul.f32 -1.442695, %v478_v63  ;;  %v480_v45 = vadd.f32 %v479_v0, %v1592_v19  ;;  %v818_v55 = vsub.f32 %v802_v42, %v632_v49  ;;  %v637_v56 = vadd.f32 %v636_v46, %v1598_v29 }
 0x15b   : > { %v483_v2 = vpop.f32.mrf.mxu0 }
 0x15c   : > { %1135 = vpow2.f32 %v980_v1  ;;  %v484_v3 = vadd.f32 %v483_v2, %v1580_v54  ;;  %v803_v5 = vmax.f32 %v480_v45, 0.0  ;;  %v1072_v2 = vpop.f32.mrf.mxu1 }
 0x15d   : > { %v485_v4 = vpop.f32.mrf.mxu0 }
 0x15e   : > { %v981_v6 = vmul.f32 -1.442695, %v484_v3  ;;  %v486_v57 = vadd.f32 %v485_v4, %v1592_v19 }
 0x15f   : > { %v489_v7 = vpop.f32.mrf.mxu0 }
 0x160   : > { %1137 = vpow2.f32 %v981_v6  ;;  %v490_v8 = vadd.f32 %v489_v7, %v1580_v54  ;;  %v804_v4 = vmax.f32 %v486_v57, 0.0 }
 0x161   : > { %v1132_v9 = vpop.eup %1131  ;;  %v1587_v10 = vpop.f32.mrf.mxu0 }
 0x162   : > { %v753_v11 = vadd.f32 1.0, %v1132_v9  ;;  %v982_v13 = vmul.f32 -1.442695, %v490_v8  ;;  %v819_v9 = vsub.f32 %v803_v5, %v637_v56 }
 0x163   : > { %v495_v14 = vpop.f32.mrf.mxu0 }
 0x164   : > { %1139 = vrcp.f32 %v753_v11  ;;  %v496_v15 = vadd.f32 %v495_v14, %v1580_v54  ;;  %v492_v14 = vadd.f32 %v1587_v10, %v1592_v19 }
 0x165   : > { %v1134_v16 = vpop.eup %1133  ;;  %1141 = vpow2.f32 %v982_v13  ;;  %v1590_v18 = vpop.f32.mrf.mxu0  ;;  %v642_v13 = vadd.f32 %v1069_v35, %v1598_v29 }
 0x166   : > { %v754_v20 = vadd.f32 1.0, %v1134_v16  ;;  %v983_v22 = vmul.f32 -1.442695, %v496_v15  ;;  %v498_v26 = vadd.f32 %v1590_v18, %v1592_v19 }
 0x167   : > { %v501_v23 = vpop.f32.mrf.mxu0 }
 0x168   : > { %1143 = vrcp.f32 %v754_v20  ;;  %v502_v24 = vadd.f32 %v501_v23, %v1580_v54  ;;  %v646_v20 = vpop.f32.mrf.mxu1  ;;  %v806_v18 = vmax.f32 %v498_v26, 0.0 }
 0x169   : > { %v1136_v25 = vpop.eup %1135  ;;  %1145 = vpow2.f32 %v983_v22  ;;  %v1595_v27 = vpop.f32.mrf.mxu0  ;;  %v820_v22 = vsub.f32 %v804_v4, %v642_v13 }
 0x16a   : > { %v755_v30 = vadd.f32 1.0, %v1136_v25  ;;  %v984_v31 = vmul.f32 -1.442695, %v502_v24  ;;  %v1075_v32 = vpop.f32.mrf.mxu1 }
 0x16b   : > { %v507_v33 = vpop.f32.mrf.mxu0 }
 0x16c   : > { %1147 = vrcp.f32 %v755_v30  ;;  %v508_v36 = vadd.f32 %v507_v33, %v1580_v54  ;;  %v805_v30 = vmax.f32 %v492_v14, 0.0  ;;  %v656_v45 = vpop.f32.mrf.mxu1 }
 0x16d   : > { %v1138_v37 = vpop.eup %1137  ;;  %1149 = vpow2.f32 %v984_v31  ;;  %v1604_v38 = vpop.f32.mrf.mxu0  ;;  %v647_v31 = vadd.f32 %v646_v20, %v1598_v29 }
 0x16e   : > { %v756_v40 = vadd.f32 1.0, %v1138_v37  ;;  %v985_v41 = vmul.f32 -1.442695, %v508_v36  ;;  %v1078_v57 = vpop.f32.mrf.mxu1  ;;  %v510_v5 = vadd.f32 %v1604_v38, %v1592_v19 }
 0x16f   : > { %v513_v43 = vpop.f32.mrf.mxu0 }
 0x170   : > { %1151 = vrcp.f32 %v756_v40  ;;  %v514_v47 = vadd.f32 %v513_v43, %v1580_v54  ;;  %v821_v43 = vsub.f32 %v805_v30, %v647_v31 }
 0x171   : > { %v1140_v48 = vpop.eup %1139  ;;  %1153 = vpow2.f32 %v985_v41  ;;  %v1611_v50 = vpop.f32.mrf.mxu0 }
 0x172   : > { %v1142_v51 = vpop.eup %1141  ;;  %v833_v52 = vmul.f32 %v1140_v48, %v817_v44  ;;  %v986_v53 = vmul.f32 -1.442695, %v514_v47  ;;  %v504_v44 = vadd.f32 %v1595_v27, %v1592_v19  ;;  %v652_v48 = vadd.f32 %v1072_v2, %v1598_v29 }
 0x173   : > { %v757_v58 = vadd.f32 1.0, %v1142_v51  ;;  %v519_v59 = vpop.f32.mrf.mxu0  ;;  %v516_v4 = vadd.f32 %v1611_v50, %v1592_v19 }
 0x174   : > { %v849_v60 = vadd.f32 %v833_v52, %v627_v34  ;;  %1155 = vpow2.f32 %v986_v53  ;;  %v520_v61 = vadd.f32 %v519_v59, %v1580_v54 }
 0x175   : > { %v1144_v62 = vpop.eup %1143  ;;  %1157 = vrcp.f32 %v757_v58  ;;  %v1616_v63 = vpop.f32.mrf.mxu0 }
 0x176   : > { %v1146_v0 = vpop.eup %1145  ;;  %v834_v1 = vmul.f32 %v1144_v62, %v818_v55  ;;  %865 = vst [vmem:[%s1618_s11] sm:$0xff] %v849_v60  ;;  %v987_v3 = vmul.f32 -1.442695, %v520_v61  ;;  %v822_v55 = vsub.f32 %v806_v18, %v652_v48  ;;  %v807_v60 = vmax.f32 %v504_v44, 0.0 }
 0x177   : > { %v758_v6 = vadd.f32 1.0, %v1146_v0  ;;  %v525_v7 = vpop.f32.mrf.mxu0  ;;  %v672_v18 = vadd.f32 %v1078_v57, %v1598_v29 }
 0x178   : > { %v850_v8 = vadd.f32 %v834_v1, %v632_v49  ;;  %1159 = vpow2.f32 %v987_v3  ;;  %v526_v11 = vadd.f32 %v525_v7, %v1580_v54 }
 0x179   : > { %v1148_v12 = vpop.eup %1147  ;;  %1161 = vrcp.f32 %v758_v6  ;;  %v1625_v15 = vpop.f32.mrf.mxu0 }
 0x17a   : > { %v1150_v16 = vpop.eup %1149  ;;  %866 = vst [vmem:[%s1618_s11 + $0x8] sm:$0xff] %v850_v8  ;;  %v835_v17 = vmul.f32 %v1148_v12, %v819_v9  ;;  %v988_v21 = vmul.f32 -1.442695, %v526_v11  ;;  %v666_v6 = vpop.f32.mrf.mxu1  ;;  %v808_v11 = vmax.f32 %v510_v5, 0.0 }
 0x17b   : > { %v759_v23 = vadd.f32 1.0, %v1150_v16  ;;  %v531_v24 = vpop.f32.mrf.mxu0  ;;  %v667_v50 = vadd.f32 %v666_v6, %v1598_v29 }
 0x17c   : > { %v851_v25 = vadd.f32 %v835_v17, %v637_v56  ;;  %1163 = vpow2.f32 %v988_v21  ;;  %v532_v28 = vadd.f32 %v531_v24, %v1580_v54  ;;  %v657_v56 = vadd.f32 %v656_v45, %v1598_v29  ;;  %v1081_v24 = vpop.f32.mrf.mxu1 }
 0x17d   : > { %v1152_v10 = vpop.eup %1151  ;;  %1165 = vrcp.f32 %v759_v23  ;;  %v1632_v33 = vpop.f32.mrf.mxu0  ;;  %v662_v17 = vadd.f32 %v1075_v32, %v1598_v29  ;;  %v522_v23 = vadd.f32 %v1616_v63, %v1592_v19 }
 0x17e   : > { %v1154_v34 = vpop.eup %1153  ;;  %867 = vst [vmem:[%s1618_s11 + $0x10] sm:$0xff] %v851_v25  ;;  %v836_v35 = vmul.f32 %v1152_v10, %v820_v22  ;;  %v989_v36 = vmul.f32 -1.442695, %v532_v28  ;;  %v823_v38 = vsub.f32 %v807_v60, %v657_v56  ;;  %v809_v22 = vmax.f32 %v516_v4, 0.0  ;;  %v676_v63 = vpop.f32.mrf.mxu1 }
 0x17f   : > { %v760_v37 = vadd.f32 1.0, %v1154_v34  ;;  %v537_v39 = vpop.f32.mrf.mxu0  ;;  %v824_v10 = vsub.f32 %v808_v11, %v662_v17 }
 0x180   : > { %v852_v40 = vadd.f32 %v836_v35, %v642_v13  ;;  %1167 = vpow2.f32 %v989_v36  ;;  %v538_v41 = vadd.f32 %v537_v39, %v1580_v54  ;;  %v825_v35 = vsub.f32 %v809_v22, %v667_v50 }
 0x181   : > { %v1156_v42 = vpop.eup %1155  ;;  %1169 = vrcp.f32 %v760_v37  ;;  %v1638_v46 = vpop.f32.mrf.mxu0  ;;  %v810_v36 = vmax.f32 %v522_v23, 0.0  ;;  %v528_v37 = vadd.f32 %v1625_v15, %v1592_v19  ;;  %v534_v15 = vadd.f32 %v1632_v33, %v1592_v19 }
 0x182   : > { %v1158_v47 = vpop.eup %1157  ;;  %868 = vst [vmem:[%s1618_s11 + $0x18] sm:$0xff] %v852_v40  ;;  %v761_v49 = vadd.f32 1.0, %v1156_v42  ;;  %v990_v51 = vmul.f32 -1.442695, %v538_v41  ;;  %v677_v42 = vadd.f32 %v676_v63, %v1598_v29  ;;  %v682_v33 = vadd.f32 %v1081_v24, %v1598_v29 }
 0x183   : > { %v837_v52 = vmul.f32 %v1158_v47, %v821_v43  ;;  %v543_v53 = vpop.f32.mrf.mxu0  ;;  %v826_v45 = vsub.f32 %v810_v36, %v672_v18  ;;  %v811_v47 = vmax.f32 %v528_v37, 0.0  ;;  %v812_v57 = vmax.f32 %v534_v15, 0.0 }
 0x184   : > { %1171 = vrcp.f32 %v761_v49  ;;  %v544_v27 = vadd.f32 %v543_v53, %v1580_v54 }
 0x185   : > { %v1160_v58 = vpop.eup %1159  ;;  %v853_v59 = vadd.f32 %v837_v52, %v647_v31  ;;  %1173 = vpow2.f32 %v990_v51  ;;  %v1646_v61 = vpop.f32.mrf.mxu0 }
 0x186   : > { %v1162_v62 = vpop.eup %1161  ;;  %v762_v0 = vadd.f32 1.0, %v1160_v58  ;;  %v991_v1 = vmul.f32 -1.442695, %v544_v27  ;;  %v1084_v52 = vpop.f32.mrf.mxu1  ;;  %v540_v58 = vadd.f32 %v1638_v46, %v1592_v19  ;;  %v546_v6 = vadd.f32 %v1646_v61, %v1592_v19 }
 0x187   : > { %869 = vst [vmem:[%s1618_s11 + $0x20] sm:$0xff] %v853_v59  ;;  %v838_v2 = vmul.f32 %v1162_v62, %v822_v55  ;;  %v549_v3 = vpop.f32.mrf.mxu0  ;;  %v692_v61 = vadd.f32 %v1084_v52, %v1598_v29 }
 0x188   : > { %1175 = vrcp.f32 %v762_v0  ;;  %v550_v7 = vadd.f32 %v549_v3, %v1580_v54  ;;  %v686_v5 = vpop.f32.mrf.mxu1  ;;  %v813_v3 = vmax.f32 %v540_v58, 0.0 }
 0x189   : > { %v1164_v8 = vpop.eup %1163  ;;  %v854_v9 = vadd.f32 %v838_v2, %v652_v48  ;;  %1177 = vpow2.f32 %v991_v1  ;;  %v1652_v12 = vpop.f32.mrf.mxu0  ;;  %v828_v1 = vsub.f32 %v812_v57, %v682_v33  ;;  %v687_v4 = vadd.f32 %v686_v5, %v1598_v29 }
 0x18a   : > { %v1166_v13 = vpop.eup %1165  ;;  %v763_v14 = vadd.f32 1.0, %v1164_v8  ;;  %v992_v16 = vmul.f32 -1.442695, %v550_v7  ;;  %v1087_v46 = vpop.f32.mrf.mxu1 }
 0x18b   : > { %870 = vst [vmem:[%s1618_s11 + $0x28] sm:$0xff] %v854_v9  ;;  %v839_v20 = vmul.f32 %v1166_v13, %v823_v38  ;;  %v555_v21 = vpop.f32.mrf.mxu0  ;;  %v829_v11 = vsub.f32 %v813_v3, %v687_v4  ;;  %v814_v13 = vmax.f32 %v546_v6, 0.0 }
 0x18c   : > { %1179 = vrcp.f32 %v763_v14  ;;  %v556_v25 = vadd.f32 %v555_v21, %v1580_v54  ;;  %v552_v14 = vadd.f32 %v1652_v12, %v1592_v19 }
 0x18d   : > { %v1168_v26 = vpop.eup %1167  ;;  %v855_v28 = vadd.f32 %v839_v20, %v657_v56  ;;  %1181 = vpow2.f32 %v992_v16  ;;  %v827_v56 = vsub.f32 %v811_v47, %v677_v42  ;;  %v696_v16 = vpop.f32.mrf.mxu1  ;;  %v830_v23 = vsub.f32 %v814_v13, %v692_v61 }
 0x18e   : > { %v1170_v30 = vpop.eup %1169  ;;  %v764_v31 = vadd.f32 1.0, %v1168_v26  ;;  %v993_v32 = vmul.f32 -1.442695, %v556_v25  ;;  %v557_v20 = vpop.f32.mrf.mxu0  ;;  %v697_v21 = vadd.f32 %v696_v16, %v1598_v29  ;;  %v815_v24 = vmax.f32 %v552_v14, 0.0 }
 0x18f   : > { %871 = vst [vmem:[%s1618_s11 + $0x30] sm:$0xff] %v855_v28  ;;  %v840_v34 = vmul.f32 %v1170_v30, %v824_v10  ;;  %v558_v25 = vadd.f32 %v557_v20, %v1592_v19 }
 0x190   : > { %1183 = vrcp.f32 %v764_v31  ;;  %v831_v10 = vsub.f32 %v815_v24, %v697_v21 }
 0x191   : > { %v1172_v39 = vpop.eup %1171  ;;  %v856_v54 = vadd.f32 %v840_v34, %v662_v17  ;;  %1185 = vpow2.f32 %v993_v32  ;;  %v816_v30 = vmax.f32 %v558_v25, 0.0  ;;  %v702_v32 = vadd.f32 %v1087_v46, %v1598_v29 }
 0x192   : > { %v1174_v40 = vpop.eup %1173  ;;  %v841_v41 = vmul.f32 %v1172_v39, %v825_v35 }
 0x193   : > { %872 = vst [vmem:[%s1618_s11 + $0x38] sm:$0xff] %v856_v54  ;;  %v765_v43 = vadd.f32 1.0, %v1174_v40  ;;  %v832_v36 = vsub.f32 %v816_v30, %v702_v32 }
 0x194   : > { %v857_v44 = vadd.f32 %v841_v41, %v667_v50 }
 0x195   : > { %v1176_v48 = vpop.eup %1175  ;;  %1187 = vrcp.f32 %v765_v43 }
 0x196   : > { %v1178_v49 = vpop.eup %1177  ;;  %873 = vst [vmem:[%s1618_s11 + $0x40] sm:$0xff] %v857_v44  ;;  %v842_v51 = vmul.f32 %v1176_v48, %v826_v45 }
 0x197   : > { %v766_v53 = vadd.f32 1.0, %v1178_v49 }
 0x198   : > { %v858_v55 = vadd.f32 %v842_v51, %v672_v18 }
 0x199   : > { %v1180_v27 = vpop.eup %1179  ;;  %1189 = vrcp.f32 %v766_v53 }
 0x19a   : > { %v1182_v59 = vpop.eup %1181  ;;  %874 = vst [vmem:[%s1618_s11 + $0x48] sm:$0xff] %v858_v55  ;;  %v843_v60 = vmul.f32 %v1180_v27, %v827_v56 }
 0x19b   : > { %v767_v62 = vadd.f32 1.0, %v1182_v59 }
 0x19c   : > { %v859_v0 = vadd.f32 %v843_v60, %v677_v42 }
 0x19d   : > { %v1184_v2 = vpop.eup %1183  ;;  %1191 = vrcp.f32 %v767_v62 }
 0x19e   : > { %v1186_v7 = vpop.eup %1185  ;;  %875 = vst [vmem:[%s1618_s11 + $0x50] sm:$0xff] %v859_v0  ;;  %v844_v8 = vmul.f32 %v1184_v2, %v828_v1 }
 0x19f   : > { %v768_v9 = vadd.f32 1.0, %v1186_v7 }
 0x1a0   : > { %v860_v38 = vadd.f32 %v844_v8, %v682_v33 }
 0x1a1   : > { %1193 = vrcp.f32 %v768_v9 }
 0x1a2   : > { %v1188_v17 = vpop.eup %1187  ;;  %876 = vst [vmem:[%s1618_s11 + $0x58] sm:$0xff] %v860_v38 }
 0x1a3   : > { %v845_v50 = vmul.f32 %v1188_v17, %v829_v11 }
 0x1a5   : > { %v861_v22 = vadd.f32 %v845_v50, %v687_v4 }
 0x1a6   : > { %v1190_v12 = vpop.eup %1189 }
 0x1a7   : > { %877 = vst [vmem:[%s1618_s11 + $0x60] sm:$0xff] %v861_v22  ;;  %v846_v26 = vmul.f32 %v1190_v12, %v830_v23 }
 0x1a9   : > { %v862_v28 = vadd.f32 %v846_v26, %v692_v61 }
 0x1aa   : > { %v1192_v31 = vpop.eup %1191 }
 0x1ab   : > { %878 = vst [vmem:[%s1618_s11 + $0x68] sm:$0xff] %v862_v28  ;;  %v847_v34 = vmul.f32 %v1192_v31, %v831_v10 }
 0x1ad   : > { %v863_v35 = vadd.f32 %v847_v34, %v697_v21 }
 0x1ae   : > { %v1194_v19 = vpop.eup %1193 }
 0x1af   : > { %879 = vst [vmem:[%s1618_s11 + $0x70] sm:$0xff] %v863_v35  ;;  %v848_v37 = vmul.f32 %v1194_v19, %v832_v36 }
 0x1b1   : > { %v864_v29 = vadd.f32 %v848_v37, %v702_v32 }
 0x1b3   : > { %880 = vst [vmem:[%s1618_s11 + $0x78] sm:$0xff] %v864_v29 }
 0x1b4   : > { %1208 = shalt.err (!%p1205_p3)
}
 0x1b5   : > { %s1209_s22 = scalar_lea.hbm %s1692_s20, 2048  ;;  %s1213_s27 = scalar_lea.hbm %s1743_s4, 4096 }
 0x1b6   : > { %p1210_p4 = scmp.ne.s32.totalorder %s1692_s20, %s1209_s22  ;;  %p1214_p9 = scmp.lt.s32.totalorder %s1692_s20, %s1743_s4 }
 0x1b7   : > { %p1215_p10 = scmp.lt.s32.totalorder %s1213_s27, %s1209_s22 }
 0x1b8   : > { %p1211_p7 = pnand %p1210_p4, %p1325_p5 }
 0x1b9   : > { %p1216_p11 = por %p1215_p10, %p1214_p9 }
 0x1ba   : > { %p1212_p8 = pneg %p1211_p7 }
 0x1bc   : > { %p1217_p12 = pnand %p1216_p11, %p1212_p8 }
 0x1be   : > { %1220 = shalt.err (!%p1217_p12)
}
 0x1bf   : > { %s1260_s10 = smov 128   ;;  %s1261_s11 = smov 8  }
 0x1c0   : > { %1088 = dma.vmem_to_hbm [thread:$0]  (%p1325_p5), %s1694_s13, 2048, %s1692_s20, %s1699_s23, %s1260_s10, %s1260_s10, %s1261_s11  }
 0x1c1 PF: > { %p1094_p13 = scmp.ge.s32.totalorder %s1255_s18, 2  ;;  %s910_s12 = sand.u32 1, %s1243_s15  }
 0x1c2   : > { %s911_s14 = scalar_lea.sflag [#allocation3], %s910_s12 }
 0x1c3   : > { %p1091_p0 = pnand %p1094_p13, %p1329_p6 }
 0x1c5   : > { %p1092_p1 = pneg %p1091_p0 }
 0x1c7   : > { %1238 = dma.done.wait (%p1092_p1), %s911_s14, 2048  }
 0x1c8   : > { %1240 = vsyncadd (%p1092_p1), %s911_s14, 4294965248  ;;  %p14_p2 = scmp.ge.s32.totalorder %s1312_s21, 4   ;;  %s1746_s15 = smov %s1247_s16 }
 0x1c9   : > { %s1747_s16 = smov %s1251_s17  ;;  %s1748_s17 = smov %s1323_s24 }
 0x1ca   : > { %s1749_s18 = smov %s1312_s21  ;;  %16 = sbr.rel (!%p14_p2) target bundleno = 3 (0x3), region = 74 }
 0x1cf   :  { %916 = vsyncpa [#allocation3], 1 }
 0x1d0   :  { %918 = vsyncpa [#allocation3 + $0x1], 1 }

</bundles_post_ra>
